<compile_context>
chip_gen: v5e
topology: v5e:2x2
jax: 0.10.0
libtpu: 0.0.40
codegen_flags: <defaults>
</compile_context>

<pallas_src>
import functools

import numpy as np
import jax
import jax.numpy as jnp
from jax.experimental import pallas as pl
from jax.experimental.pallas import tpu as pltpu


# ---------------------------------------------------------------------------
# Constants fixed by the ActorSpline constructor.
# ---------------------------------------------------------------------------
COEF_NUM = 8                         # coefficient_num (spline channels)
SPLINE_K = 3                         # spline order k
GRID_NUM = 3                         # base grid: linspace(-1, 1, GRID_NUM + 1)
EMB_DIM = 8                          # id_embedding output dim
VOCAB = 48                           # id_embedding vocabulary size
HIDDEN = 128                         # hidden_size
N_BASIS = GRID_NUM + SPLINE_K        # basis functions per channel = 6
N_COEF = COEF_NUM * N_BASIS          # 48


def make_extended_grid():
    """Replicates extend_grid(linspace(-1,1,4).expand(8,4), k_extend=3)."""
    grid = np.linspace(-1.0, 1.0, GRID_NUM + 1, dtype=np.float32)
    grid = np.tile(grid[None, :], (COEF_NUM, 1))
    h = (grid[:, [-1]] - grid[:, [0]]) / np.float32(grid.shape[1] - 1)
    for _ in range(SPLINE_K):
        grid = np.concatenate([grid[:, [0]] - h, grid], axis=1)
        grid = np.concatenate([grid, grid[:, [-1]] + h], axis=1)
    return grid.astype(np.float32)                      # (8, 10)


EXT_GRID = make_extended_grid()                         # rows are identical by construction
GRID_1D = tuple(float(v) for v in EXT_GRID[0])          # scalar knot constants for the kernel


# ---------------------------------------------------------------------------
# Pallas kernel.
# ---------------------------------------------------------------------------
def _actor_spline_kernel(ids_ref, budT_ref, w1e_ref, b1_ref, w2_ref, b2_ref,
                         sb_ref, o_ref):
    bb = ids_ref.shape[-1]
    mm_dtype = w1e_ref.dtype                            # bf16 (default) or f32

    # feature_net(id_embedding(obs)) = relu(W1E[:, id] + b1) via a one-hot matmul.
    rows = jax.lax.broadcasted_iota(jnp.int32, (VOCAB, bb), 0)
    onehot = (rows == ids_ref[...]).astype(jnp.float32).astype(mm_dtype)   # (48, bb)
    f = jnp.dot(w1e_ref[...], onehot, preferred_element_type=jnp.float32)  # (128, bb)
    f = jnp.maximum(f + b1_ref[...], 0.0)                                  # f32

    # net: Linear(128, 48); rows pre-permuted to basis-major (i*8+j) and pre-scaled
    # by scale_sp[j] in the wrapper.
    c = jnp.dot(w2_ref[...], f.astype(mm_dtype), preferred_element_type=jnp.float32)
    c = c + b2_ref[...]                                                    # (48, bb) f32

    bud = budT_ref[...]                                                    # (8, bb) f32

    # B_batch: Cox–de Boor recursion, fully unrolled.  Knots and the reciprocal
    # denominators are trace-time Python constants (multiplies only, no divides);
    # knots strictly increasing -> torch.nan_to_num is a no-op.
    G = GRID_1D
    nk = len(G)                                                            # 10
    basis = [((bud >= G[i]) & (bud < G[i + 1])).astype(jnp.float32)
             for i in range(nk - 1)]
    for kk in range(1, SPLINE_K + 1):
        nxt = []
        for i in range(nk - 1 - kk):
            r1 = 1.0 / (G[i + kk] - G[i])
            r2 = 1.0 / (G[i + kk + 1] - G[i + 1])
            nxt.append((bud - G[i]) * r1 * basis[i]
                       + (G[i + kk + 1] - bud) * r2 * basis[i + 1])
        basis = nxt                                     # N_BASIS arrays, each (8, bb)

    # y[j,b] = sum_i basis_i(bud[j,b]) * (scale_sp[j] * coef[b,j,i]); scale_sp is
    # already folded into c, so a plain sublane reduce finishes the spline term.
    acc = basis[0] * c[0:COEF_NUM, :]
    for i in range(1, N_BASIS):
        acc = acc + basis[i] * c[i * COEF_NUM:(i + 1) * COEF_NUM, :]
    spline = jnp.sum(acc, axis=0, keepdims=True)                           # (1, bb)

    base = jnp.sum(bud * jax.nn.sigmoid(bud), axis=0, keepdims=True)       # SiLU, (1, bb)
    o_ref[...] = (spline + sb_ref[0, 0] * base).astype(o_ref.dtype)        # lane-dense store


# ---------------------------------------------------------------------------
# Wrapper.
# ---------------------------------------------------------------------------
def _round_up(n, m):
    return ((n + m - 1) // m) * m


@functools.partial(jax.jit, static_argnames=("block_b", "use_bf16_matmul",
                                             "budget_transposed", "vmem_limit_bytes"))
def actor_spline_forward(obs_ids, budget, params, block_b=4096,
                         use_bf16_matmul=True, budget_transposed=False,
                         vmem_limit_bytes=None):
    """ActorSpline.forward.  obs_ids: [B] int, budget: [B, 8] f32  ->  [B, 1] f32.

    block_b: batch tile on the lane axis; sweep 2048–8192 (keep <= ~8192 on v5e
    with the default scoped-VMEM limit, or pass vmem_limit_bytes).
    budget_transposed: pass budget already as (8, B) to skip the wrapper transpose.
    """
    B = obs_ids.shape[0]

    # Tile: multiple of 128, no larger than needed, and >= 2 grid blocks whenever
    # possible so both v7x TensorCores get work ("parallel" grid axis).
    bb = max(128, min(int(block_b), _round_up(pl.cdiv(B, 2), 128)))
    bb = _round_up(bb, 128)
    n_blocks = pl.cdiv(B, bb)

    mm_dtype = jnp.bfloat16 if use_bf16_matmul else jnp.float32

    # ---- weight prep (trace-time, tiny arrays; done ONCE, not per grid step) ----
    E = params["id_embedding"].astype(jnp.float32)             # (48, 8)
    w1 = params["w1"].astype(jnp.float32)                      # (128, 8)  torch (out,in)
    b1 = params["b1"].astype(jnp.float32)[:, None]             # (128, 1)
    w2 = params["w2"].astype(jnp.float32)                      # (48, 128)
    b2 = params["b2"].astype(jnp.float32)                      # (48,)
    ssp = params["scale_sp"].astype(jnp.float32)[:, 0]         # (8,)
    sb = params["scale_base"].astype(jnp.float32).reshape(1, 1)

    # Fold the embedding into layer 1: f = relu(w1 @ E[id] + b1) = relu(W1E[:, id] + b1).
    w1e = jnp.dot(w1, E.T, precision="highest")                # (128, 48)

    # Permute layer-2 rows from channel-major (j*6+i, the coef.view(B,8,1,6) order)
    # to basis-major (i*8+j) and fold scale_sp[j] into those rows.
    perm = np.arange(N_COEF).reshape(COEF_NUM, N_BASIS).T.reshape(-1)
    sspv = jnp.tile(ssp, N_BASIS)                              # s[i*8+j] = scale_sp[j]
    w2k = w2[perm, :] * sspv[:, None]                          # (48, 128)
    b2k = (b2[perm] * sspv)[:, None]                           # (48, 1)

    w1e = w1e.astype(mm_dtype)
    w2k = w2k.astype(mm_dtype)

    # ---- per-sample inputs (no pad; ragged last block handled by Pallas) ----
    ids2d = obs_ids.astype(jnp.int32).reshape(1, B)            # (1, B)
    if budget_transposed:
        budT = budget.astype(jnp.float32)                      # already (8, B)
    else:
        budT = budget.astype(jnp.float32).T                    # (8, B): only remaining wrapper pass

    flops = B * (2 * HIDDEN * VOCAB + 2 * N_COEF * HIDDEN + 80 * COEF_NUM)
    bytes_accessed = (B * (4 + 4 * COEF_NUM + 4)
                      + 4 * (HIDDEN * (VOCAB + 1) + N_COEF * (HIDDEN + 1) + 1))

    out = pl.pallas_call(
        _actor_spline_kernel,
        out_shape=jax.ShapeDtypeStruct((1, B), jnp.float32),
        grid_spec=pltpu.PrefetchScalarGridSpec(
            num_scalar_prefetch=0,
            grid=(n_blocks,),
            in_specs=[
                pl.BlockSpec((1, bb), lambda i: (0, i)),               # ids (int32)
                pl.BlockSpec((COEF_NUM, bb), lambda i: (0, i)),        # budget^T
                pl.BlockSpec((HIDDEN, VOCAB), lambda i: (0, 0)),       # W1E (grid-invariant)
                pl.BlockSpec((HIDDEN, 1), lambda i: (0, 0)),           # b1
                pl.BlockSpec((N_COEF, HIDDEN), lambda i: (0, 0)),      # w2 (permuted * scale_sp)
                pl.BlockSpec((N_COEF, 1), lambda i: (0, 0)),           # b2 (permuted * scale_sp)
                pl.BlockSpec(memory_space=pltpu.MemorySpace.SMEM),     # scale_base scalar
            ],
            out_specs=pl.BlockSpec((1, bb), lambda i: (0, i)),         # lane-dense output
        ),
        compiler_params=pltpu.CompilerParams(
            dimension_semantics=("parallel",),
            vmem_limit_bytes=vmem_limit_bytes),
        cost_estimate=pl.CostEstimate(flops=int(flops),
                                      transcendentals=int(B * COEF_NUM),
                                      bytes_accessed=int(bytes_accessed)),
    )(ids2d, budT, w1e, b1, w2k, b2k, sb)

    return out[0][:, None]                                             # (B, 1)


# ---------------------------------------------------------------------------
# Pure-JAX reference (port of ActorSpline.forward / B_batch).
# ---------------------------------------------------------------------------
def _b_batch(x, grid, k):
    xe = x[:, :, None]
    ge = grid[None, :, :]
    if k == 0:
        value = ((xe >= ge[:, :, :-1]) & (xe < ge[:, :, 1:])).astype(x.dtype)
    else:
        b_km1 = _b_batch(x, grid, k - 1)
        value = ((xe - ge[:, :, :-(k + 1)]) / (ge[:, :, k:-1] - ge[:, :, :-(k + 1)])
                 * b_km1[:, :, :-1]
                 + (ge[:, :, k + 1:] - xe) / (ge[:, :, k + 1:] - ge[:, :, 1:-k])
                 * b_km1[:, :, 1:])
    return jnp.nan_to_num(value)


def reference_forward(obs_ids, budget, params):
    grid = jnp.asarray(EXT_GRID)
    emb = jnp.take(params["id_embedding"], obs_ids.astype(jnp.int32), axis=0)
    feature = jax.nn.relu(
        jnp.dot(emb, params["w1"].T, precision="highest") + params["b1"])
    coef = jnp.dot(feature, params["w2"].T, precision="highest") + params["b2"]
    coef = coef.reshape(emb.shape[0], COEF_NUM, 1, N_BASIS)
    Bsp = _b_batch(budget, grid, SPLINE_K)                     # (B, 8, 6)
    base = jax.nn.silu(budget)                                 # (B, 8)
    y = jnp.einsum("ijk,ijlk->ijl", Bsp, coef)                 # (B, 8, 1)
    y = (params["scale_base"][None, :, :] * base[:, :, None]
         + params["scale_sp"][None, :, :] * y)
    return jnp.sum(y, axis=1)                                  # (B, 1)


def init_params(key):
    """Synthetic params with PyTorch nn.Linear (out,in) layouts and init bounds.
    scale_sp is randomized (instead of the constant torch init) so the per-channel
    scale_sp fold into w2/b2 is actually exercised by the check."""
    ks = jax.random.split(key, 7)

    def linear(kw, kb, fan_in, fan_out):
        bound = 1.0 / np.sqrt(fan_in)
        w = jax.random.uniform(kw, (fan_out, fan_in), jnp.float32, -bound, bound)
        b = jax.random.uniform(kb, (fan_out,), jnp.float32, -bound, bound)
        return w, b

    id_emb = jax.random.normal(ks[0], (VOCAB, EMB_DIM), jnp.float32)
    w1, b1 = linear(ks[1], ks[2], EMB_DIM, HIDDEN)             # feature_net Linear(8,128)
    w2, b2 = linear(ks[3], ks[4], HIDDEN, N_COEF)              # net Linear(128,48)
    scale_base = jax.random.uniform(ks[5], (1, 1), jnp.float32, -1.0, 1.0)
    scale_sp = jax.random.uniform(ks[6], (COEF_NUM, 1), jnp.float32, 0.1, 1.0) / np.sqrt(COEF_NUM)
    return dict(id_embedding=id_emb, w1=w1, b1=b1, w2=w2, b2=b2,
                scale_base=scale_base, scale_sp=scale_sp)


if __name__ == "__main__":
    key = jax.random.PRNGKey(0)
    k_par, k_obs, k_bud = jax.random.split(key, 3)

    batch = 333          # not a multiple of 128: exercises ragged last block + >=2 blocks
    params = init_params(k_par)
    obs_ids = jax.random.randint(k_obs, (batch,), 0, VOCAB, dtype=jnp.int32)
    budget = jax.random.uniform(k_bud, (batch, COEF_NUM), jnp.float32, -1.0, 1.0)

    ref = reference_forward(obs_ids, budget, params)

    # Exact-precision path: must match the pure-JAX reference tightly.
    out_f32 = actor_spline_forward(obs_ids, budget, params, use_bf16_matmul=False)
    jax.block_until_ready(out_f32)
    assert out_f32.shape == (batch, 1)
    err32 = float(jnp.max(jnp.abs(out_f32 - ref)))
    assert jnp.allclose(out_f32, ref, atol=1e-4, rtol=1e-4), f"f32 mismatch: {err32}"

    # Default path (bf16 matmul weights): looser check; exactness established above.
    out_bf16 = actor_spline_forward(obs_ids, budget, params)
    jax.block_until_ready(out_bf16)
    assert out_bf16.shape == (batch, 1)
    err16 = float(jnp.max(jnp.abs(out_bf16 - ref)))
    assert jnp.allclose(out_bf16, ref, atol=1e-1, rtol=1e-1), f"bf16 mismatch: {err16}"

    print("KERNEL_OK")
</pallas_src>

<mosaic_0001>
module attributes {stable_mosaic.version = 11 : i64} {
  func.func @_actor_spline_kernel(%arg0: i32, %arg1: memref<1x256xi32, #tpu.memory_space<vmem>>, %arg2: memref<8x256xf32, #tpu.memory_space<vmem>>, %arg3: memref<128x48xf32, #tpu.memory_space<vmem>>, %arg4: memref<128x1xf32, #tpu.memory_space<vmem>>, %arg5: memref<48x128xf32, #tpu.memory_space<vmem>>, %arg6: memref<48x1xf32, #tpu.memory_space<vmem>>, %arg7: memref<1x1xf32, #tpu.memory_space<smem>>, %arg8: memref<1x256xf32, #tpu.memory_space<vmem>>) attributes {dimension_semantics = [#tpu.dimension_semantics<parallel>], iteration_bounds = array<i64: 2>, scalar_prefetch = 0 : i64, scratch_operands = 0 : i64, tpu.core_type = #tpu.core_type<tc>, window_params = [{transform_indices = @transform_0, window_bounds = array<i64: 1, 256>}, {transform_indices = @transform_1, window_bounds = array<i64: 8, 256>}, {pipeline_mode = #tpu.pipeline_mode<synchronous>, transform_indices = @transform_2, window_bounds = array<i64: 128, 48>}, {pipeline_mode = #tpu.pipeline_mode<synchronous>, transform_indices = @transform_3, window_bounds = array<i64: 128, 1>}, {pipeline_mode = #tpu.pipeline_mode<synchronous>, transform_indices = @transform_4, window_bounds = array<i64: 48, 128>}, {pipeline_mode = #tpu.pipeline_mode<synchronous>, transform_indices = @transform_5, window_bounds = array<i64: 48, 1>}, {transform_indices = @transform_6, window_bounds = array<i64: 1, 1>}, {transform_indices = @transform_7, window_bounds = array<i64: 1, 256>}]} {
    %0 = tpu.iota {dimensions = array<i32: 0>} : vector<48x256xi32>
    %c0 = arith.constant 0 : index
    %c0_0 = arith.constant 0 : index
    %1 = vector.load %arg1[%c0, %c0_0] : memref<1x256xi32, #tpu.memory_space<vmem>>, vector<1x256xi32>
    %2 = vector.broadcast %1 : vector<1x256xi32> to vector<48x256xi32>
    %3 = arith.cmpi eq, %0, %2 : vector<48x256xi32>
    %4 = arith.extui %3 : vector<48x256xi1> to vector<48x256xi32>
    %5 = arith.sitofp %4 : vector<48x256xi32> to vector<48x256xf32>
    %c0_1 = arith.constant 0 : index
    %c0_2 = arith.constant 0 : index
    %6 = vector.load %arg3[%c0_1, %c0_2] : memref<128x48xf32, #tpu.memory_space<vmem>>, vector<128x48xf32>
    %cst = arith.constant dense<0.000000e+00> : vector<128x256xf32>
    %7 = tpu.matmul %6, %5, %cst {dimension_numbers = #tpu.dot_dimension_numbers<[1], [0], [0], [1], [0, 0, 1, 1], [], []>} : vector<128x48xf32>, vector<48x256xf32>, vector<128x256xf32> -> vector<128x256xf32>
    %c0_3 = arith.constant 0 : index
    %c0_4 = arith.constant 0 : index
    %8 = vector.load %arg4[%c0_3, %c0_4] : memref<128x1xf32, #tpu.memory_space<vmem>>, vector<128x1xf32>
    %9 = vector.broadcast %8 : vector<128x1xf32> to vector<128x256xf32>
    %10 = arith.addf %7, %9 : vector<128x256xf32>
    %cst_5 = arith.constant 0.000000e+00 : f32
    %11 = vector.broadcast %cst_5 : f32 to vector<128x256xf32>
    %12 = arith.maximumf %10, %11 : vector<128x256xf32>
    %c0_6 = arith.constant 0 : index
    %c0_7 = arith.constant 0 : index
    %13 = vector.load %arg5[%c0_6, %c0_7] : memref<48x128xf32, #tpu.memory_space<vmem>>, vector<48x128xf32>
    %cst_8 = arith.constant dense<0.000000e+00> : vector<48x256xf32>
    %14 = tpu.matmul %13, %12, %cst_8 {dimension_numbers = #tpu.dot_dimension_numbers<[1], [0], [0], [1], [0, 0, 1, 1], [], []>} : vector<48x128xf32>, vector<128x256xf32>, vector<48x256xf32> -> vector<48x256xf32>
    %c0_9 = arith.constant 0 : index
    %c0_10 = arith.constant 0 : index
    %15 = vector.load %arg6[%c0_9, %c0_10] : memref<48x1xf32, #tpu.memory_space<vmem>>, vector<48x1xf32>
    %16 = vector.broadcast %15 : vector<48x1xf32> to vector<48x256xf32>
    %17 = arith.addf %14, %16 : vector<48x256xf32>
    %c0_11 = arith.constant 0 : index
    %c0_12 = arith.constant 0 : index
    %18 = vector.load %arg2[%c0_11, %c0_12] : memref<8x256xf32, #tpu.memory_space<vmem>>, vector<8x256xf32>
    %cst_13 = arith.constant -3.00000024 : f32
    %19 = vector.broadcast %cst_13 : f32 to vector<8x256xf32>
    %20 = arith.cmpf oge, %18, %19 : vector<8x256xf32>
    %cst_14 = arith.constant -2.33333349 : f32
    %21 = vector.broadcast %cst_14 : f32 to vector<8x256xf32>
    %22 = arith.cmpf olt, %18, %21 : vector<8x256xf32>
    %23 = arith.andi %20, %22 : vector<8x256xi1>
    %24 = arith.extui %23 : vector<8x256xi1> to vector<8x256xi32>
    %25 = arith.sitofp %24 : vector<8x256xi32> to vector<8x256xf32>
    %cst_15 = arith.constant -2.33333349 : f32
    %26 = vector.broadcast %cst_15 : f32 to vector<8x256xf32>
    %27 = arith.cmpf oge, %18, %26 : vector<8x256xf32>
    %cst_16 = arith.constant -1.66666675 : f32
    %28 = vector.broadcast %cst_16 : f32 to vector<8x256xf32>
    %29 = arith.cmpf olt, %18, %28 : vector<8x256xf32>
    %30 = arith.andi %27, %29 : vector<8x256xi1>
    %31 = arith.extui %30 : vector<8x256xi1> to vector<8x256xi32>
    %32 = arith.sitofp %31 : vector<8x256xi32> to vector<8x256xf32>
    %cst_17 = arith.constant -1.66666675 : f32
    %33 = vector.broadcast %cst_17 : f32 to vector<8x256xf32>
    %34 = arith.cmpf oge, %18, %33 : vector<8x256xf32>
    %cst_18 = arith.constant -1.000000e+00 : f32
    %35 = vector.broadcast %cst_18 : f32 to vector<8x256xf32>
    %36 = arith.cmpf olt, %18, %35 : vector<8x256xf32>
    %37 = arith.andi %34, %36 : vector<8x256xi1>
    %38 = arith.extui %37 : vector<8x256xi1> to vector<8x256xi32>
    %39 = arith.sitofp %38 : vector<8x256xi32> to vector<8x256xf32>
    %cst_19 = arith.constant -1.000000e+00 : f32
    %40 = vector.broadcast %cst_19 : f32 to vector<8x256xf32>
    %41 = arith.cmpf oge, %18, %40 : vector<8x256xf32>
    %cst_20 = arith.constant -0.333333343 : f32
    %42 = vector.broadcast %cst_20 : f32 to vector<8x256xf32>
    %43 = arith.cmpf olt, %18, %42 : vector<8x256xf32>
    %44 = arith.andi %41, %43 : vector<8x256xi1>
    %45 = arith.extui %44 : vector<8x256xi1> to vector<8x256xi32>
    %46 = arith.sitofp %45 : vector<8x256xi32> to vector<8x256xf32>
    %cst_21 = arith.constant -0.333333343 : f32
    %47 = vector.broadcast %cst_21 : f32 to vector<8x256xf32>
    %48 = arith.cmpf oge, %18, %47 : vector<8x256xf32>
    %cst_22 = arith.constant 0.333333343 : f32
    %49 = vector.broadcast %cst_22 : f32 to vector<8x256xf32>
    %50 = arith.cmpf olt, %18, %49 : vector<8x256xf32>
    %51 = arith.andi %48, %50 : vector<8x256xi1>
    %52 = arith.extui %51 : vector<8x256xi1> to vector<8x256xi32>
    %53 = arith.sitofp %52 : vector<8x256xi32> to vector<8x256xf32>
    %cst_23 = arith.constant 0.333333343 : f32
    %54 = vector.broadcast %cst_23 : f32 to vector<8x256xf32>
    %55 = arith.cmpf oge, %18, %54 : vector<8x256xf32>
    %cst_24 = arith.constant 1.000000e+00 : f32
    %56 = vector.broadcast %cst_24 : f32 to vector<8x256xf32>
    %57 = arith.cmpf olt, %18, %56 : vector<8x256xf32>
    %58 = arith.andi %55, %57 : vector<8x256xi1>
    %59 = arith.extui %58 : vector<8x256xi1> to vector<8x256xi32>
    %60 = arith.sitofp %59 : vector<8x256xi32> to vector<8x256xf32>
    %cst_25 = arith.constant 1.000000e+00 : f32
    %61 = vector.broadcast %cst_25 : f32 to vector<8x256xf32>
    %62 = arith.cmpf oge, %18, %61 : vector<8x256xf32>
    %cst_26 = arith.constant 1.66666675 : f32
    %63 = vector.broadcast %cst_26 : f32 to vector<8x256xf32>
    %64 = arith.cmpf olt, %18, %63 : vector<8x256xf32>
    %65 = arith.andi %62, %64 : vector<8x256xi1>
    %66 = arith.extui %65 : vector<8x256xi1> to vector<8x256xi32>
    %67 = arith.sitofp %66 : vector<8x256xi32> to vector<8x256xf32>
    %cst_27 = arith.constant 1.66666675 : f32
    %68 = vector.broadcast %cst_27 : f32 to vector<8x256xf32>
    %69 = arith.cmpf oge, %18, %68 : vector<8x256xf32>
    %cst_28 = arith.constant 2.33333349 : f32
    %70 = vector.broadcast %cst_28 : f32 to vector<8x256xf32>
    %71 = arith.cmpf olt, %18, %70 : vector<8x256xf32>
    %72 = arith.andi %69, %71 : vector<8x256xi1>
    %73 = arith.extui %72 : vector<8x256xi1> to vector<8x256xi32>
    %74 = arith.sitofp %73 : vector<8x256xi32> to vector<8x256xf32>
    %cst_29 = arith.constant 2.33333349 : f32
    %75 = vector.broadcast %cst_29 : f32 to vector<8x256xf32>
    %76 = arith.cmpf oge, %18, %75 : vector<8x256xf32>
    %cst_30 = arith.constant 3.00000024 : f32
    %77 = vector.broadcast %cst_30 : f32 to vector<8x256xf32>
    %78 = arith.cmpf olt, %18, %77 : vector<8x256xf32>
    %79 = arith.andi %76, %78 : vector<8x256xi1>
    %80 = arith.extui %79 : vector<8x256xi1> to vector<8x256xi32>
    %81 = arith.sitofp %80 : vector<8x256xi32> to vector<8x256xf32>
    %cst_31 = arith.constant -3.00000024 : f32
    %82 = vector.broadcast %cst_31 : f32 to vector<8x256xf32>
    %83 = arith.subf %18, %82 : vector<8x256xf32>
    %cst_32 = arith.constant 1.49999988 : f32
    %84 = vector.broadcast %cst_32 : f32 to vector<8x256xf32>
    %85 = arith.mulf %83, %84 : vector<8x256xf32>
    %86 = arith.mulf %85, %25 : vector<8x256xf32>
    %cst_33 = arith.constant -1.66666675 : f32
    %87 = vector.broadcast %cst_33 : f32 to vector<8x256xf32>
    %88 = arith.subf %87, %18 : vector<8x256xf32>
    %cst_34 = arith.constant 1.49999988 : f32
    %89 = vector.broadcast %cst_34 : f32 to vector<8x256xf32>
    %90 = arith.mulf %88, %89 : vector<8x256xf32>
    %91 = arith.mulf %90, %32 : vector<8x256xf32>
    %92 = arith.addf %86, %91 : vector<8x256xf32>
    %cst_35 = arith.constant -2.33333349 : f32
    %93 = vector.broadcast %cst_35 : f32 to vector<8x256xf32>
    %94 = arith.subf %18, %93 : vector<8x256xf32>
    %cst_36 = arith.constant 1.49999988 : f32
    %95 = vector.broadcast %cst_36 : f32 to vector<8x256xf32>
    %96 = arith.mulf %94, %95 : vector<8x256xf32>
    %97 = arith.mulf %96, %32 : vector<8x256xf32>
    %cst_37 = arith.constant -1.000000e+00 : f32
    %98 = vector.broadcast %cst_37 : f32 to vector<8x256xf32>
    %99 = arith.subf %98, %18 : vector<8x256xf32>
    %cst_38 = arith.constant 1.49999988 : f32
    %100 = vector.broadcast %cst_38 : f32 to vector<8x256xf32>
    %101 = arith.mulf %99, %100 : vector<8x256xf32>
    %102 = arith.mulf %101, %39 : vector<8x256xf32>
    %103 = arith.addf %97, %102 : vector<8x256xf32>
    %cst_39 = arith.constant -1.66666675 : f32
    %104 = vector.broadcast %cst_39 : f32 to vector<8x256xf32>
    %105 = arith.subf %18, %104 : vector<8x256xf32>
    %cst_40 = arith.constant 1.49999988 : f32
    %106 = vector.broadcast %cst_40 : f32 to vector<8x256xf32>
    %107 = arith.mulf %105, %106 : vector<8x256xf32>
    %108 = arith.mulf %107, %39 : vector<8x256xf32>
    %cst_41 = arith.constant -0.333333343 : f32
    %109 = vector.broadcast %cst_41 : f32 to vector<8x256xf32>
    %110 = arith.subf %109, %18 : vector<8x256xf32>
    %cst_42 = arith.constant 1.500000e+00 : f32
    %111 = vector.broadcast %cst_42 : f32 to vector<8x256xf32>
    %112 = arith.mulf %110, %111 : vector<8x256xf32>
    %113 = arith.mulf %112, %46 : vector<8x256xf32>
    %114 = arith.addf %108, %113 : vector<8x256xf32>
    %cst_43 = arith.constant -1.000000e+00 : f32
    %115 = vector.broadcast %cst_43 : f32 to vector<8x256xf32>
    %116 = arith.subf %18, %115 : vector<8x256xf32>
    %cst_44 = arith.constant 1.500000e+00 : f32
    %117 = vector.broadcast %cst_44 : f32 to vector<8x256xf32>
    %118 = arith.mulf %116, %117 : vector<8x256xf32>
    %119 = arith.mulf %118, %46 : vector<8x256xf32>
    %cst_45 = arith.constant 0.333333343 : f32
    %120 = vector.broadcast %cst_45 : f32 to vector<8x256xf32>
    %121 = arith.subf %120, %18 : vector<8x256xf32>
    %cst_46 = arith.constant 1.500000e+00 : f32
    %122 = vector.broadcast %cst_46 : f32 to vector<8x256xf32>
    %123 = arith.mulf %121, %122 : vector<8x256xf32>
    %124 = arith.mulf %123, %53 : vector<8x256xf32>
    %125 = arith.addf %119, %124 : vector<8x256xf32>
    %cst_47 = arith.constant -0.333333343 : f32
    %126 = vector.broadcast %cst_47 : f32 to vector<8x256xf32>
    %127 = arith.subf %18, %126 : vector<8x256xf32>
    %cst_48 = arith.constant 1.500000e+00 : f32
    %128 = vector.broadcast %cst_48 : f32 to vector<8x256xf32>
    %129 = arith.mulf %127, %128 : vector<8x256xf32>
    %130 = arith.mulf %129, %53 : vector<8x256xf32>
    %cst_49 = arith.constant 1.000000e+00 : f32
    %131 = vector.broadcast %cst_49 : f32 to vector<8x256xf32>
    %132 = arith.subf %131, %18 : vector<8x256xf32>
    %cst_50 = arith.constant 1.500000e+00 : f32
    %133 = vector.broadcast %cst_50 : f32 to vector<8x256xf32>
    %134 = arith.mulf %132, %133 : vector<8x256xf32>
    %135 = arith.mulf %134, %60 : vector<8x256xf32>
    %136 = arith.addf %130, %135 : vector<8x256xf32>
    %cst_51 = arith.constant 0.333333343 : f32
    %137 = vector.broadcast %cst_51 : f32 to vector<8x256xf32>
    %138 = arith.subf %18, %137 : vector<8x256xf32>
    %cst_52 = arith.constant 1.500000e+00 : f32
    %139 = vector.broadcast %cst_52 : f32 to vector<8x256xf32>
    %140 = arith.mulf %138, %139 : vector<8x256xf32>
    %141 = arith.mulf %140, %60 : vector<8x256xf32>
    %cst_53 = arith.constant 1.66666675 : f32
    %142 = vector.broadcast %cst_53 : f32 to vector<8x256xf32>
    %143 = arith.subf %142, %18 : vector<8x256xf32>
    %cst_54 = arith.constant 1.49999988 : f32
    %144 = vector.broadcast %cst_54 : f32 to vector<8x256xf32>
    %145 = arith.mulf %143, %144 : vector<8x256xf32>
    %146 = arith.mulf %145, %67 : vector<8x256xf32>
    %147 = arith.addf %141, %146 : vector<8x256xf32>
    %cst_55 = arith.constant 1.000000e+00 : f32
    %148 = vector.broadcast %cst_55 : f32 to vector<8x256xf32>
    %149 = arith.subf %18, %148 : vector<8x256xf32>
    %cst_56 = arith.constant 1.49999988 : f32
    %150 = vector.broadcast %cst_56 : f32 to vector<8x256xf32>
    %151 = arith.mulf %149, %150 : vector<8x256xf32>
    %152 = arith.mulf %151, %67 : vector<8x256xf32>
    %cst_57 = arith.constant 2.33333349 : f32
    %153 = vector.broadcast %cst_57 : f32 to vector<8x256xf32>
    %154 = arith.subf %153, %18 : vector<8x256xf32>
    %cst_58 = arith.constant 1.49999988 : f32
    %155 = vector.broadcast %cst_58 : f32 to vector<8x256xf32>
    %156 = arith.mulf %154, %155 : vector<8x256xf32>
    %157 = arith.mulf %156, %74 : vector<8x256xf32>
    %158 = arith.addf %152, %157 : vector<8x256xf32>
    %cst_59 = arith.constant 1.66666675 : f32
    %159 = vector.broadcast %cst_59 : f32 to vector<8x256xf32>
    %160 = arith.subf %18, %159 : vector<8x256xf32>
    %cst_60 = arith.constant 1.49999988 : f32
    %161 = vector.broadcast %cst_60 : f32 to vector<8x256xf32>
    %162 = arith.mulf %160, %161 : vector<8x256xf32>
    %163 = arith.mulf %162, %74 : vector<8x256xf32>
    %cst_61 = arith.constant 3.00000024 : f32
    %164 = vector.broadcast %cst_61 : f32 to vector<8x256xf32>
    %165 = arith.subf %164, %18 : vector<8x256xf32>
    %cst_62 = arith.constant 1.49999988 : f32
    %166 = vector.broadcast %cst_62 : f32 to vector<8x256xf32>
    %167 = arith.mulf %165, %166 : vector<8x256xf32>
    %168 = arith.mulf %167, %81 : vector<8x256xf32>
    %169 = arith.addf %163, %168 : vector<8x256xf32>
    %cst_63 = arith.constant -3.00000024 : f32
    %170 = vector.broadcast %cst_63 : f32 to vector<8x256xf32>
    %171 = arith.subf %18, %170 : vector<8x256xf32>
    %cst_64 = arith.constant 0.74999994 : f32
    %172 = vector.broadcast %cst_64 : f32 to vector<8x256xf32>
    %173 = arith.mulf %171, %172 : vector<8x256xf32>
    %174 = arith.mulf %173, %92 : vector<8x256xf32>
    %cst_65 = arith.constant -1.000000e+00 : f32
    %175 = vector.broadcast %cst_65 : f32 to vector<8x256xf32>
    %176 = arith.subf %175, %18 : vector<8x256xf32>
    %cst_66 = arith.constant 0.74999994 : f32
    %177 = vector.broadcast %cst_66 : f32 to vector<8x256xf32>
    %178 = arith.mulf %176, %177 : vector<8x256xf32>
    %179 = arith.mulf %178, %103 : vector<8x256xf32>
    %180 = arith.addf %174, %179 : vector<8x256xf32>
    %cst_67 = arith.constant -2.33333349 : f32
    %181 = vector.broadcast %cst_67 : f32 to vector<8x256xf32>
    %182 = arith.subf %18, %181 : vector<8x256xf32>
    %cst_68 = arith.constant 0.74999994 : f32
    %183 = vector.broadcast %cst_68 : f32 to vector<8x256xf32>
    %184 = arith.mulf %182, %183 : vector<8x256xf32>
    %185 = arith.mulf %184, %103 : vector<8x256xf32>
    %cst_69 = arith.constant -0.333333343 : f32
    %186 = vector.broadcast %cst_69 : f32 to vector<8x256xf32>
    %187 = arith.subf %186, %18 : vector<8x256xf32>
    %cst_70 = arith.constant 0.74999994 : f32
    %188 = vector.broadcast %cst_70 : f32 to vector<8x256xf32>
    %189 = arith.mulf %187, %188 : vector<8x256xf32>
    %190 = arith.mulf %189, %114 : vector<8x256xf32>
    %191 = arith.addf %185, %190 : vector<8x256xf32>
    %cst_71 = arith.constant -1.66666675 : f32
    %192 = vector.broadcast %cst_71 : f32 to vector<8x256xf32>
    %193 = arith.subf %18, %192 : vector<8x256xf32>
    %cst_72 = arith.constant 0.74999994 : f32
    %194 = vector.broadcast %cst_72 : f32 to vector<8x256xf32>
    %195 = arith.mulf %193, %194 : vector<8x256xf32>
    %196 = arith.mulf %195, %114 : vector<8x256xf32>
    %cst_73 = arith.constant 0.333333343 : f32
    %197 = vector.broadcast %cst_73 : f32 to vector<8x256xf32>
    %198 = arith.subf %197, %18 : vector<8x256xf32>
    %cst_74 = arith.constant 7.500000e-01 : f32
    %199 = vector.broadcast %cst_74 : f32 to vector<8x256xf32>
    %200 = arith.mulf %198, %199 : vector<8x256xf32>
    %201 = arith.mulf %200, %125 : vector<8x256xf32>
    %202 = arith.addf %196, %201 : vector<8x256xf32>
    %cst_75 = arith.constant -1.000000e+00 : f32
    %203 = vector.broadcast %cst_75 : f32 to vector<8x256xf32>
    %204 = arith.subf %18, %203 : vector<8x256xf32>
    %cst_76 = arith.constant 7.500000e-01 : f32
    %205 = vector.broadcast %cst_76 : f32 to vector<8x256xf32>
    %206 = arith.mulf %204, %205 : vector<8x256xf32>
    %207 = arith.mulf %206, %125 : vector<8x256xf32>
    %cst_77 = arith.constant 1.000000e+00 : f32
    %208 = vector.broadcast %cst_77 : f32 to vector<8x256xf32>
    %209 = arith.subf %208, %18 : vector<8x256xf32>
    %cst_78 = arith.constant 7.500000e-01 : f32
    %210 = vector.broadcast %cst_78 : f32 to vector<8x256xf32>
    %211 = arith.mulf %209, %210 : vector<8x256xf32>
    %212 = arith.mulf %211, %136 : vector<8x256xf32>
    %213 = arith.addf %207, %212 : vector<8x256xf32>
    %cst_79 = arith.constant -0.333333343 : f32
    %214 = vector.broadcast %cst_79 : f32 to vector<8x256xf32>
    %215 = arith.subf %18, %214 : vector<8x256xf32>
    %cst_80 = arith.constant 7.500000e-01 : f32
    %216 = vector.broadcast %cst_80 : f32 to vector<8x256xf32>
    %217 = arith.mulf %215, %216 : vector<8x256xf32>
    %218 = arith.mulf %217, %136 : vector<8x256xf32>
    %cst_81 = arith.constant 1.66666675 : f32
    %219 = vector.broadcast %cst_81 : f32 to vector<8x256xf32>
    %220 = arith.subf %219, %18 : vector<8x256xf32>
    %cst_82 = arith.constant 0.74999994 : f32
    %221 = vector.broadcast %cst_82 : f32 to vector<8x256xf32>
    %222 = arith.mulf %220, %221 : vector<8x256xf32>
    %223 = arith.mulf %222, %147 : vector<8x256xf32>
    %224 = arith.addf %218, %223 : vector<8x256xf32>
    %cst_83 = arith.constant 0.333333343 : f32
    %225 = vector.broadcast %cst_83 : f32 to vector<8x256xf32>
    %226 = arith.subf %18, %225 : vector<8x256xf32>
    %cst_84 = arith.constant 0.74999994 : f32
    %227 = vector.broadcast %cst_84 : f32 to vector<8x256xf32>
    %228 = arith.mulf %226, %227 : vector<8x256xf32>
    %229 = arith.mulf %228, %147 : vector<8x256xf32>
    %cst_85 = arith.constant 2.33333349 : f32
    %230 = vector.broadcast %cst_85 : f32 to vector<8x256xf32>
    %231 = arith.subf %230, %18 : vector<8x256xf32>
    %cst_86 = arith.constant 0.74999994 : f32
    %232 = vector.broadcast %cst_86 : f32 to vector<8x256xf32>
    %233 = arith.mulf %231, %232 : vector<8x256xf32>
    %234 = arith.mulf %233, %158 : vector<8x256xf32>
    %235 = arith.addf %229, %234 : vector<8x256xf32>
    %cst_87 = arith.constant 1.000000e+00 : f32
    %236 = vector.broadcast %cst_87 : f32 to vector<8x256xf32>
    %237 = arith.subf %18, %236 : vector<8x256xf32>
    %cst_88 = arith.constant 0.74999994 : f32
    %238 = vector.broadcast %cst_88 : f32 to vector<8x256xf32>
    %239 = arith.mulf %237, %238 : vector<8x256xf32>
    %240 = arith.mulf %239, %158 : vector<8x256xf32>
    %cst_89 = arith.constant 3.00000024 : f32
    %241 = vector.broadcast %cst_89 : f32 to vector<8x256xf32>
    %242 = arith.subf %241, %18 : vector<8x256xf32>
    %cst_90 = arith.constant 0.74999994 : f32
    %243 = vector.broadcast %cst_90 : f32 to vector<8x256xf32>
    %244 = arith.mulf %242, %243 : vector<8x256xf32>
    %245 = arith.mulf %244, %169 : vector<8x256xf32>
    %246 = arith.addf %240, %245 : vector<8x256xf32>
    %cst_91 = arith.constant -3.00000024 : f32
    %247 = vector.broadcast %cst_91 : f32 to vector<8x256xf32>
    %248 = arith.subf %18, %247 : vector<8x256xf32>
    %cst_92 = arith.constant 0.49999994 : f32
    %249 = vector.broadcast %cst_92 : f32 to vector<8x256xf32>
    %250 = arith.mulf %248, %249 : vector<8x256xf32>
    %251 = arith.mulf %250, %180 : vector<8x256xf32>
    %cst_93 = arith.constant -0.333333343 : f32
    %252 = vector.broadcast %cst_93 : f32 to vector<8x256xf32>
    %253 = arith.subf %252, %18 : vector<8x256xf32>
    %cst_94 = arith.constant 0.49999997 : f32
    %254 = vector.broadcast %cst_94 : f32 to vector<8x256xf32>
    %255 = arith.mulf %253, %254 : vector<8x256xf32>
    %256 = arith.mulf %255, %191 : vector<8x256xf32>
    %257 = arith.addf %251, %256 : vector<8x256xf32>
    %cst_95 = arith.constant -2.33333349 : f32
    %258 = vector.broadcast %cst_95 : f32 to vector<8x256xf32>
    %259 = arith.subf %18, %258 : vector<8x256xf32>
    %cst_96 = arith.constant 0.49999997 : f32
    %260 = vector.broadcast %cst_96 : f32 to vector<8x256xf32>
    %261 = arith.mulf %259, %260 : vector<8x256xf32>
    %262 = arith.mulf %261, %191 : vector<8x256xf32>
    %cst_97 = arith.constant 0.333333343 : f32
    %263 = vector.broadcast %cst_97 : f32 to vector<8x256xf32>
    %264 = arith.subf %263, %18 : vector<8x256xf32>
    %cst_98 = arith.constant 0.49999997 : f32
    %265 = vector.broadcast %cst_98 : f32 to vector<8x256xf32>
    %266 = arith.mulf %264, %265 : vector<8x256xf32>
    %267 = arith.mulf %266, %202 : vector<8x256xf32>
    %268 = arith.addf %262, %267 : vector<8x256xf32>
    %cst_99 = arith.constant -1.66666675 : f32
    %269 = vector.broadcast %cst_99 : f32 to vector<8x256xf32>
    %270 = arith.subf %18, %269 : vector<8x256xf32>
    %cst_100 = arith.constant 0.49999997 : f32
    %271 = vector.broadcast %cst_100 : f32 to vector<8x256xf32>
    %272 = arith.mulf %270, %271 : vector<8x256xf32>
    %273 = arith.mulf %272, %202 : vector<8x256xf32>
    %cst_101 = arith.constant 1.000000e+00 : f32
    %274 = vector.broadcast %cst_101 : f32 to vector<8x256xf32>
    %275 = arith.subf %274, %18 : vector<8x256xf32>
    %cst_102 = arith.constant 5.000000e-01 : f32
    %276 = vector.broadcast %cst_102 : f32 to vector<8x256xf32>
    %277 = arith.mulf %275, %276 : vector<8x256xf32>
    %278 = arith.mulf %277, %213 : vector<8x256xf32>
    %279 = arith.addf %273, %278 : vector<8x256xf32>
    %cst_103 = arith.constant -1.000000e+00 : f32
    %280 = vector.broadcast %cst_103 : f32 to vector<8x256xf32>
    %281 = arith.subf %18, %280 : vector<8x256xf32>
    %cst_104 = arith.constant 5.000000e-01 : f32
    %282 = vector.broadcast %cst_104 : f32 to vector<8x256xf32>
    %283 = arith.mulf %281, %282 : vector<8x256xf32>
    %284 = arith.mulf %283, %213 : vector<8x256xf32>
    %cst_105 = arith.constant 1.66666675 : f32
    %285 = vector.broadcast %cst_105 : f32 to vector<8x256xf32>
    %286 = arith.subf %285, %18 : vector<8x256xf32>
    %cst_106 = arith.constant 0.49999997 : f32
    %287 = vector.broadcast %cst_106 : f32 to vector<8x256xf32>
    %288 = arith.mulf %286, %287 : vector<8x256xf32>
    %289 = arith.mulf %288, %224 : vector<8x256xf32>
    %290 = arith.addf %284, %289 : vector<8x256xf32>
    %cst_107 = arith.constant -0.333333343 : f32
    %291 = vector.broadcast %cst_107 : f32 to vector<8x256xf32>
    %292 = arith.subf %18, %291 : vector<8x256xf32>
    %cst_108 = arith.constant 0.49999997 : f32
    %293 = vector.broadcast %cst_108 : f32 to vector<8x256xf32>
    %294 = arith.mulf %292, %293 : vector<8x256xf32>
    %295 = arith.mulf %294, %224 : vector<8x256xf32>
    %cst_109 = arith.constant 2.33333349 : f32
    %296 = vector.broadcast %cst_109 : f32 to vector<8x256xf32>
    %297 = arith.subf %296, %18 : vector<8x256xf32>
    %cst_110 = arith.constant 0.49999997 : f32
    %298 = vector.broadcast %cst_110 : f32 to vector<8x256xf32>
    %299 = arith.mulf %297, %298 : vector<8x256xf32>
    %300 = arith.mulf %299, %235 : vector<8x256xf32>
    %301 = arith.addf %295, %300 : vector<8x256xf32>
    %cst_111 = arith.constant 0.333333343 : f32
    %302 = vector.broadcast %cst_111 : f32 to vector<8x256xf32>
    %303 = arith.subf %18, %302 : vector<8x256xf32>
    %cst_112 = arith.constant 0.49999997 : f32
    %304 = vector.broadcast %cst_112 : f32 to vector<8x256xf32>
    %305 = arith.mulf %303, %304 : vector<8x256xf32>
    %306 = arith.mulf %305, %235 : vector<8x256xf32>
    %cst_113 = arith.constant 3.00000024 : f32
    %307 = vector.broadcast %cst_113 : f32 to vector<8x256xf32>
    %308 = arith.subf %307, %18 : vector<8x256xf32>
    %cst_114 = arith.constant 0.49999994 : f32
    %309 = vector.broadcast %cst_114 : f32 to vector<8x256xf32>
    %310 = arith.mulf %308, %309 : vector<8x256xf32>
    %311 = arith.mulf %310, %246 : vector<8x256xf32>
    %312 = arith.addf %306, %311 : vector<8x256xf32>
    %313 = vector.extract_strided_slice %17 {offsets = [0, 0], sizes = [8, 256], strides = [1, 1]} : vector<48x256xf32> to vector<8x256xf32>
    %314 = arith.mulf %257, %313 : vector<8x256xf32>
    %315 = vector.extract_strided_slice %17 {offsets = [8, 0], sizes = [8, 256], strides = [1, 1]} : vector<48x256xf32> to vector<8x256xf32>
    %316 = arith.mulf %268, %315 : vector<8x256xf32>
    %317 = arith.addf %314, %316 : vector<8x256xf32>
    %318 = vector.extract_strided_slice %17 {offsets = [16, 0], sizes = [8, 256], strides = [1, 1]} : vector<48x256xf32> to vector<8x256xf32>
    %319 = arith.mulf %279, %318 : vector<8x256xf32>
    %320 = arith.addf %317, %319 : vector<8x256xf32>
    %321 = vector.extract_strided_slice %17 {offsets = [24, 0], sizes = [8, 256], strides = [1, 1]} : vector<48x256xf32> to vector<8x256xf32>
    %322 = arith.mulf %290, %321 : vector<8x256xf32>
    %323 = arith.addf %320, %322 : vector<8x256xf32>
    %324 = vector.extract_strided_slice %17 {offsets = [32, 0], sizes = [8, 256], strides = [1, 1]} : vector<48x256xf32> to vector<8x256xf32>
    %325 = arith.mulf %301, %324 : vector<8x256xf32>
    %326 = arith.addf %323, %325 : vector<8x256xf32>
    %327 = vector.extract_strided_slice %17 {offsets = [40, 0], sizes = [8, 256], strides = [1, 1]} : vector<48x256xf32> to vector<8x256xf32>
    %328 = arith.mulf %312, %327 : vector<8x256xf32>
    %329 = arith.addf %326, %328 : vector<8x256xf32>
    %cst_115 = arith.constant dense<0.000000e+00> : vector<256xf32>
    %330 = vector.multi_reduction <add>, %329, %cst_115 [0] : vector<8x256xf32> to vector<256xf32>
    %331 = vector.shape_cast %330 : vector<256xf32> to vector<1x256xf32>
    %332 = arith.negf %18 : vector<8x256xf32>
    %333 = math.exp %332 : vector<8x256xf32>
    %cst_116 = arith.constant 1.000000e+00 : f32
    %334 = vector.broadcast %cst_116 : f32 to vector<8x256xf32>
    %335 = arith.addf %334, %333 : vector<8x256xf32>
    %336 = arith.divf %334, %335 : vector<8x256xf32>
    %337 = arith.mulf %18, %336 : vector<8x256xf32>
    %cst_117 = arith.constant dense<0.000000e+00> : vector<256xf32>
    %338 = vector.multi_reduction <add>, %337, %cst_117 [0] : vector<8x256xf32> to vector<256xf32>
    %339 = vector.shape_cast %338 : vector<256xf32> to vector<1x256xf32>
    %c0_118 = arith.constant 0 : index
    %c0_119 = arith.constant 0 : index
    %340 = memref.load %arg7[%c0_118, %c0_119] : memref<1x1xf32, #tpu.memory_space<smem>>
    %341 = vector.broadcast %340 : f32 to vector<1x256xf32>
    %342 = arith.mulf %341, %339 : vector<1x256xf32>
    %343 = arith.addf %331, %342 : vector<1x256xf32>
    %c0_120 = arith.constant 0 : index
    %c0_121 = arith.constant 0 : index
    %344 = vector.load %arg8[%c0_120, %c0_121] : memref<1x256xf32, #tpu.memory_space<vmem>>, vector<1x256xf32>
    tpu.vector_store %arg8[%c0_120, %c0_121], %343 {strides = array<i32>} : memref<1x256xf32, #tpu.memory_space<vmem>>, vector<1x256xf32>,
    return
  }
  func.func @transform_0(%arg0: i32) -> (i32, i32) {
    %c0_i32 = arith.constant 0 : i32
    %c0_i32_0 = arith.constant 0 : i32
    return %c0_i32, %arg0 : i32, i32
  }
  func.func @transform_1(%arg0: i32) -> (i32, i32) {
    %c0_i32 = arith.constant 0 : i32
    %c0_i32_0 = arith.constant 0 : i32
    return %c0_i32, %arg0 : i32, i32
  }
  func.func @transform_2(%arg0: i32) -> (i32, i32) {
    %c0_i32 = arith.constant 0 : i32
    %c0_i32_0 = arith.constant 0 : i32
    %c0_i32_1 = arith.constant 0 : i32
    return %c0_i32, %c0_i32_0 : i32, i32
  }
  func.func @transform_3(%arg0: i32) -> (i32, i32) {
    %c0_i32 = arith.constant 0 : i32
    %c0_i32_0 = arith.constant 0 : i32
    %c0_i32_1 = arith.constant 0 : i32
    return %c0_i32, %c0_i32_0 : i32, i32
  }
  func.func @transform_4(%arg0: i32) -> (i32, i32) {
    %c0_i32 = arith.constant 0 : i32
    %c0_i32_0 = arith.constant 0 : i32
    %c0_i32_1 = arith.constant 0 : i32
    return %c0_i32, %c0_i32_0 : i32, i32
  }
  func.func @transform_5(%arg0: i32) -> (i32, i32) {
    %c0_i32 = arith.constant 0 : i32
    %c0_i32_0 = arith.constant 0 : i32
    %c0_i32_1 = arith.constant 0 : i32
    return %c0_i32, %c0_i32_0 : i32, i32
  }
  func.func @transform_6(%arg0: i32) -> (i32, i32) {
    %c0_i32 = arith.constant 0 : i32
    %c0_i32_0 = arith.constant 0 : i32
    %c0_i32_1 = arith.constant 0 : i32
    return %c0_i32, %c0_i32_0 : i32, i32
  }
  func.func @transform_7(%arg0: i32) -> (i32, i32) {
    %c0_i32 = arith.constant 0 : i32
    %c0_i32_0 = arith.constant 0 : i32
    return %c0_i32, %arg0 : i32, i32
  }
}

</mosaic_0001>

<bundles_post_ra>
// kernel: mul.6
= control target key start
LH: loop header
LB: loop body
LE: loop exit
PB: predicated region body
PF: predicated region fallthrough
CT: control target
= control target key end

     0   :  { %s51_s10 = smov 40   ;;  %s52_s11 = smov 24   ;;  %vm3_vm0 = vcmask 64512   ;;  %vm9_vm1 = vcmask 392512   ;;  %vm15_vm2 = vcmask 326912   ;;  %vm21_vm3 = vcmask 261312   ;;  %s87_s0 = inlined_call_operand.vmem [shape: f32[6,8], index: 0, kind: input, shape index: {}]   ;;  %s88_s1 = inlined_call_operand.vmem [shape: f32[48], index: 1, kind: output, shape index: {}]  }
   0x1   :  { %v41_v0 = vld [vmem:[%s87_s0 + $0x5] sm:$0x1]   ;;  %v43_v1 = vld [vmem:[%s87_s0 + $0x3] sm:$0x1]   ;;  %v45_v2 = vld [vmem:[%s87_s0 + $0x1] sm:$0x1]  }
   0x2   :  { %7 = vrot.lane.b32.xlu0 %v41_v0, %s51_s10  ;;  %19 = vrot.lane.b32.xlu1 %v43_v1, %s52_s11  ;;  %s53_s14 = smov 8   ;;  %v42_v3 = vld [vmem:[%s87_s0 + $0x4] sm:$0x1]   ;;  %v44_v4 = vld [vmem:[%s87_s0 + $0x2] sm:$0x1]   ;;  %s54_s19 = smov 32  }
   0x3   :  { %31 = vrot.lane.b32.xlu2 %v45_v2, %s53_s14  ;;  %s55_s20 = smov 16   ;;  %v2_v5 = vld [vmem:[%s87_s0] sm:$0x1]   ;;  %vm27_vm4 = vcmask 195712   ;;  %vm33_vm5 = vcmask 130112  }
   0x4   :  { %4 = vst.msk [vmem:[#allocation0] sm:$0x1] %vm3_vm0, %v2_v5  }
   0xa   :  { %13 = vrot.lane.b32.xlu0 %v42_v3, %s54_s19  ;;  %25 = vrot.lane.b32.xlu1 %v44_v4, %s55_s20 }
  0x5d   :  { %v32_v6 = vpop.permute.xlu2 %31  }
  0x74   :  { %v8_v7 = vpop.permute.xlu0 %7   ;;  %v20_v8 = vpop.permute.xlu1 %19  }
  0x75   :  { %10 = vst.msk [vmem:[#allocation0] sm:$0x1] %vm9_vm1, %v8_v7  }
  0x7c   :  { %v14_v9 = vpop.permute.xlu0 %13   ;;  %v26_v10 = vpop.permute.xlu1 %25  }
  0x7d   :  { %16 = vst.msk [vmem:[#allocation0] sm:$0x1] %vm15_vm2, %v14_v9  }
  0x7e   :  { %22 = vst.msk [vmem:[#allocation0] sm:$0x1] %vm21_vm3, %v20_v8  }
  0x7f   :  { %28 = vst.msk [vmem:[#allocation0] sm:$0x1] %vm27_vm4, %v26_v10  }
  0x80   :  { %34 = vst.msk [vmem:[#allocation0] sm:$0x1] %vm33_vm5, %v32_v6  }
  0x87   :  { %v37_v11 = vld [vmem:[#allocation0] sm:$0x1] }
  0x88   :  { %40 = vst [vmem:[%s88_s1] sm:$0x1] %v37_v11 }

// kernel: tile.7
= control target key start
LH: loop header
LB: loop body
LE: loop exit
PB: predicated region body
PF: predicated region fallthrough
CT: control target
= control target key end

     0   :  { %s22_s0 = inlined_call_operand.vmem [shape: f32[8], index: 0, kind: input, shape index: {}]   ;;  %s23_s1 = inlined_call_operand.vmem [shape: f32[6,8], index: 1, kind: output, shape index: {}]  }
   0x1   :  { %v4_v0 = vld [vmem:[%s22_s0] ss:$0 sm:$0xff] }
   0x2   :  { %5 = vst [vmem:[%s23_s1] sm:$0xff] %v4_v0 }

// kernel: actor_spline_forward.1
= control target key start
LH: loop header
LB: loop body
LE: loop exit
PB: predicated region body
PF: predicated region fallthrough
CT: control target
= control target key end

     0   :  { %s2304_s0 = inlined_call_operand.vmem [shape: s32[1,333], index: 0, kind: input, shape index: {}]   ;;  %s2305_s1 = inlined_call_operand.vmem [shape: f32[8,333], index: 1, kind: input, shape index: {}]   ;;  %s2306_s2 = inlined_call_operand.vmem [shape: f32[128,48], index: 2, kind: input, shape index: {}]   ;;  %s2307_s3 = inlined_call_operand.vmem [shape: f32[128,1], index: 3, kind: input, shape index: {}]   ;;  %s2308_s4 = inlined_call_operand.vmem [shape: f32[48,128], index: 4, kind: input, shape index: {}]   ;;  %s2309_s5 = inlined_call_operand.vmem [shape: f32[48,1], index: 5, kind: input, shape index: {}]   ;;  %s2310_s6 = inlined_call_operand.<no memory space> [shape: f32[1,1], index: 6, kind: input, shape index: {}]   ;;  %s2311_s7 = inlined_call_operand.hbm [shape: f32[1,333], index: 7, kind: output, shape index: {}]  }
   0x1   :  { %12 = sst [smem:[#allocation2]] %s2310_s6 }
   0x2   :  { %13 = vsyncpa [#allocation4], 0 }
   0x3   :  { %15 = vsyncpa [#allocation4 + $0x1], 0  ;;  %s1636_s26 = smov 0   ;;  %s1638_s27 = smov 0  }
   0x4   :  { %s1640_s28 = smov 0   ;;  %s1642_s29 = smov 0  }
   0x5 LB: > { %s1344_s6 = sadd.s32 4294967295, %s1587_s29   ;;  %s1345_s30 = sadd.s32 4294967294, %s1587_s29   ;;  %s1587_s29 = sphi %s1642_s29, %s2319_s29   ;;  %s1583_s28 = sphi %s1640_s28, %s2318_s28   ;;  %s1579_s27 = sphi %s1638_s27, %s2317_s27   ;;  %s1575_s26 = sphi %s1636_s26, %s2316_s26  }
   0x6   : > { %s1659_s8 = sadd.s32 1, %s1587_s29   ;;  %s185_s9 = sadd.s32 1, %s1583_s28 }
   0x7   : > { %s182_s10 = ssub.s32 %s1587_s29, %s1659_s8  ;;  %p195_p0 = scmp.ne.s32.totalorder %s1583_s28, %s1579_s27 }
   0x8   : > { %p183_p1 = scmp.eq.s32.totalorder %s182_s10, 0  ;;  %p196_p2 = scmp.eq.s32.totalorder %s1344_s6, 1 }
   0x9   : > { %p201_p3 = scmp.ne.s32.totalorder %s1579_s27, %s1575_s26  ;;  %p202_p4 = scmp.eq.s32.totalorder %s1345_s30, 1 }
   0xa   : > { %s1669_s11 = scalar_select %p183_p1, %s1583_s28, %s185_s9  }
   0xb   : > { %p1671_p5 = por %p196_p2, %p195_p0  ;;  %p1675_p6 = por %p202_p4, %p201_p3 }
   0xc   : > { %p1348_p7 = scmp.ge.s32.totalorder %s1587_s29, 1  ;;  %p266_p8 = scmp.lt.s32.totalorder %s1587_s29, 3 }
   0xe   : > { %p267_p9 = pnand %p1348_p7, %p266_p8 }
   0xf   : > { %s1684_s16 = sshll.u32 (!%p267_p9), %s1344_s6, 1  ;;  %s1239_s30 = sld [smem:[#allocation2]] (!%p267_p9) }
  0x10   : > { %270 = sbr.rel (%p267_p9) target bundleno = 507 (0x1fb), region = 48  ;;  %p313_p10 = scmp.lt.s32.totalorder (!%p267_p9), %s1684_s16, 2 }
  0x15   : > { %v415_v0 = vld [vmem:[%s2307_s3 + $0x78] sm:$0xff]  ;;  %v338_v1 = vlaneseq  ;;  %v413_v2 = vld [vmem:[%s2307_s3 + $0x68] sm:$0xff]  ;;  %v1589_v3 = vmov 0   ;;  %s1694_s19 = scalar_select %p313_p10, %s1684_s16, 2  ;;  %v414_v9 = vld [vmem:[%s2307_s3 + $0x70] sm:$0xff]  ;;  %v1590_v15 = vmov 1.0  }
  0x16   : > { %1503 = vset.pattern.permute.xlu0 %v1589_v3  ;;  %1504 = vset.pattern.permute.xlu1 %v1589_v3  ;;  %v411_v5 = vld [vmem:[%s2307_s3 + $0x58] sm:$0xff]  ;;  %v412_v14 = vld [vmem:[%s2307_s3 + $0x60] sm:$0xff]  ;;  %v409_v17 = vld [vmem:[%s2307_s3 + $0x48] sm:$0xff]  ;;  %vm496_vm12 = vcmask 392192   ;;  %s1265_s15 = ssub.s32 (%p1671_p5), 3, %s1684_s16 }
  0x17   : > { %493 = vperm.xlu0 %1503, %v415_v0   ;;  %v1691_v4 = vshrl.u32 %v338_v1, 7  ;;  %483 = vperm.xlu1 %1504, %v413_v2   ;;  %s315_s24 = scalar_lea.vmem %s2304_s0, %s1694_s19  ;;  %v408_v18 = vld [vmem:[%s2307_s3 + $0x40] sm:$0xff]  ;;  %v1753_v20 = vld [vmem:[%s2306_s2 + $0x58] sm:$0xff]  ;;  %v410_v21 = vld [vmem:[%s2307_s3 + $0x50] sm:$0xff]  ;;  %s1352_s23 = sshll.u32 %s1694_s19, 3 }
  0x18   : > { %1505 = vset.pattern.permute.xlu2 %v1589_v3  ;;  %v345_v8 = vld [vmem:[%s315_s24] sm:$0x3]  ;;  %v406_v22 = vld [vmem:[%s2307_s3 + $0x30] sm:$0xff]  ;;  %v405_v23 = vld [vmem:[%s2307_s3 + $0x28] sm:$0xff]  ;;  %s1940_s6 = scalar_lea.vmem %s2305_s1, %s1352_s23  ;;  %s306_s19 = sand.u32 1, %s1579_s27  }
  0x19   : > { %473 = vperm.xlu2 %1505, %v411_v5   ;;  %v344_v6 = vadd.s32 40, %v1691_v4  ;;  %v343_v7 = vadd.s32 32, %v1691_v4  ;;  %v1708_v10 = vperm.slane %v345_v8, 0  ;;  %v347_v11 = vperm.slane %v345_v8, 1  ;;  %v384_v19 = vld [vmem:[%s2306_s2] sm:$0xff]  ;;  %v385_v24 = vld [vmem:[%s2306_s2 + $0x8] sm:$0xff] }
  0x1a   : > { %v342_v12 = vadd.s32 24, %v1691_v4  ;;  %v341_v13 = vadd.s32 16, %v1691_v4  ;;  %v340_v16 = vadd.s32 8, %v1691_v4  ;;  %v396_v25 = vld [vmem:[%s2306_s2 + $0x60] sm:$0xff]  ;;  %v407_v26 = vld [vmem:[%s2307_s3 + $0x38] sm:$0xff]  ;;  %v402_v28 = vld [vmem:[%s2307_s3 + $0x10] sm:$0xff] }
  0x1b   : > { %vm358_vm0 = vcmp.eq.s32.totalorder %v344_v6, %v1708_v10  ;;  %vm359_vm1 = vcmp.eq.s32.totalorder %v344_v6, %v347_v11  ;;  %vm356_vm2 = vcmp.eq.s32.totalorder %v343_v7, %v1708_v10  ;;  %vm357_vm3 = vcmp.eq.s32.totalorder %v343_v7, %v347_v11  ;;  %v403_v27 = vld [vmem:[%s2307_s3 + $0x18] sm:$0xff]  ;;  %v386_v29 = vld [vmem:[%s2306_s2 + $0x10] sm:$0xff]  ;;  %v397_v30 = vld [vmem:[%s2306_s2 + $0x68] sm:$0xff]  ;;  %s1349_s9 = sshll.u32 %s306_s19, 1  ;;  %s2245_s14 = scalar_lea.sflag [#allocation4], %s306_s19 }
  0x1c   : > { %1365 = vmatpush.msk.msra.mxu0 %vm358_vm0, %v1590_v15  ;;  %1387 = vmatpush.msk.msra.mxu1 %vm359_vm1, %v1590_v15  ;;  %vm354_vm4 = vcmp.eq.s32.totalorder %v342_v12, %v1708_v10  ;;  %vm355_vm5 = vcmp.eq.s32.totalorder %v342_v12, %v347_v11  ;;  %vm352_vm6 = vcmp.eq.s32.totalorder %v341_v13, %v1708_v10  ;;  %v404_v31 = vld [vmem:[%s2307_s3 + $0x20] sm:$0xff]  ;;  %v387_v33 = vld [vmem:[%s2306_s2 + $0x18] sm:$0xff]  ;;  %v398_v34 = vld [vmem:[%s2306_s2 + $0x70] sm:$0xff]  ;;  %s308_s10 = scalar_lea.vmem [#allocation3], %s1349_s9  ;;  %p1266_p11 = scmp.lt.s32.totalorder (%p1671_p5), %s1265_s15, 2 }
  0x1d   : > { %1456 = vmatpush.msk.msra.mxu3 %vm359_vm1, %v1590_v15  ;;  %vm353_vm7 = vcmp.eq.s32.totalorder %v341_v13, %v347_v11  ;;  %1450 = vmatpush.msk.msra.mxu2 %vm358_vm0, %v1590_v15  ;;  %vm350_vm8 = vcmp.eq.s32.totalorder %v340_v16, %v1708_v10  ;;  %vm351_vm9 = vcmp.eq.s32.totalorder %v340_v16, %v347_v11  ;;  %v400_v32 = vld [vmem:[%s2307_s3] sm:$0xff]  ;;  %v401_v35 = vld [vmem:[%s2307_s3 + $0x8] sm:$0xff]  ;;  %v399_v37 = vld [vmem:[%s2306_s2 + $0x78] sm:$0xff] }
  0x1e   : > { %1366 = vmatpush.msk.msra.mxu0 %vm356_vm2, %v1590_v15  ;;  %1388 = vmatpush.msk.msra.mxu1 %vm357_vm3, %v1590_v15  ;;  %vm348_vm10 = vcmp.eq.s32.totalorder %v1691_v4, %v1708_v10  ;;  %vm349_vm11 = vcmp.eq.s32.totalorder %v1691_v4, %v347_v11  ;;  %v388_v36 = vld [vmem:[%s2306_s2 + $0x20] sm:$0xff]  ;;  %v715_v38 = vld [vmem:[%s2309_s5 + $0x10] sm:$0xff]  ;;  %v389_v39 = vld [vmem:[%s2306_s2 + $0x28] sm:$0xff] }
  0x1f   : > { %488 = vperm.xlu0 %1503, %v414_v9   ;;  %478 = vperm.xlu1 %1504, %v412_v14   ;;  %v713_v40 = vld [vmem:[%s2309_s5] sm:$0xff]  ;;  %v718_v41 = vld [vmem:[%s2309_s5 + $0x28] sm:$0xff]  ;;  %v390_v42 = vld [vmem:[%s2306_s2 + $0x30] sm:$0xff] }
  0x20   : > { %1457 = vmatpush.msk.msra.mxu3 %vm357_vm3, %v1590_v15  ;;  %1367 = vmatpush.msk.msra.mxu0 %vm354_vm4, %v1590_v15  ;;  %v716_v43 = vld [vmem:[%s2309_s5 + $0x18] sm:$0xff]  ;;  %v392_v45 = vld [vmem:[%s2306_s2 + $0x40] sm:$0xff]  ;;  %v714_v46 = vld [vmem:[%s2309_s5 + $0x8] sm:$0xff] }
  0x21   : > { %1389 = vmatpush.msk.msra.mxu1 %vm355_vm5, %v1590_v15  ;;  %1451 = vmatpush.msk.msra.mxu2 %vm356_vm2, %v1590_v15  ;;  %v391_v44 = vld [vmem:[%s2306_s2 + $0x38] sm:$0xff]  ;;  %v393_v47 = vld [vmem:[%s2306_s2 + $0x48] sm:$0xff]  ;;  %v717_v48 = vld [vmem:[%s2309_s5 + $0x20] sm:$0xff] }
  0x22   : > { %1458 = vmatpush.msk.msra.mxu3 %vm355_vm5, %v1590_v15  ;;  %1368 = vmatpush.msk.msra.mxu0 %vm352_vm6, %v1590_v15  ;;  %v394_v49 = vld [vmem:[%s2306_s2 + $0x50] sm:$0xff] }
  0x23   : > { %1390 = vmatpush.msk.msra.mxu1 %vm353_vm7, %v1590_v15  ;;  %1452 = vmatpush.msk.msra.mxu2 %vm354_vm4, %v1590_v15 }
  0x24   : > { %1459 = vmatpush.msk.msra.mxu3 %vm353_vm7, %v1590_v15  ;;  %1369 = vmatpush.msk.msra.mxu0 %vm350_vm8, %v1590_v15 }
  0x25   : > { %1391 = vmatpush.msk.msra.mxu1 %vm351_vm9, %v1590_v15  ;;  %468 = vperm.xlu2 %1505, %v410_v21  }
  0x26   : > { %1460 = vmatpush.msk.msra.mxu3 %vm351_vm9, %v1590_v15  ;;  %1370 = vmatpush.msk.msra.mxu0 %vm348_vm10, %v1590_v15 }
  0x27   : > { %463 = vperm.xlu0 %1503, %v409_v17   ;;  %458 = vperm.xlu1 %1504, %v408_v18  }
  0x28   : > { %1392 = vmatpush.msk.msra.mxu1 %vm349_vm11, %v1590_v15  ;;  %1461 = vmatpush.msk.msra.mxu3 %vm349_vm11, %v1590_v15 }
  0x29   : > { %1371 = vmatmul.msk.f32.vlgmr.msra.gmra.mxu0 %vm496_vm12, %v384_v19  ;;  %1393 = vmatmul.msk.f32.vlgmr.msra.gmra.mxu1 %vm496_vm12, %v384_v19 }
  0x2a   : > { %1404 = vmatmul.msk.f32.vlgmr.msra.gmra.mxu3 %vm496_vm12, %v1753_v20  ;;  %1453 = vmatpush.msk.msra.mxu2 %vm352_vm6, %v1590_v15 }
  0x2c   : > { %1454 = vmatpush.msk.msra.mxu2 %vm350_vm8, %v1590_v15 }
  0x2d   : > { %453 = vperm.xlu2 %1505, %v407_v26  }
  0x2e   : > { %1455 = vmatpush.msk.msra.mxu2 %vm348_vm10, %v1590_v15 }
  0x2f   : > { %448 = vperm.xlu0 %1503, %v406_v22   ;;  %443 = vperm.xlu1 %1504, %v405_v23  }
  0x30   : > { %1383 = vmatmul.msk.f32.vlgmr.msra.gmra.mxu2 %vm496_vm12, %v396_v25 }
  0x31   : > { %1372 = vmatmul.msk.f32.gmra.mxu0 %vm496_vm12, %v385_v24  ;;  %1394 = vmatmul.msk.f32.gmra.mxu1 %vm496_vm12, %v385_v24 }
  0x32   : > { %1405 = vmatmul.msk.f32.gmra.mxu3 %vm496_vm12, %v396_v25 }
  0x35   : > { %438 = vperm.xlu2 %1505, %v404_v31  }
  0x37   : > { %433 = vperm.xlu0 %1503, %v403_v27   ;;  %428 = vperm.xlu1 %1504, %v402_v28  }
  0x38   : > { %1384 = vmatmul.msk.f32.gmra.mxu2 %vm496_vm12, %v397_v30 }
  0x39   : > { %1373 = vmatmul.msk.f32.gmra.mxu0 %vm496_vm12, %v386_v29  ;;  %1395 = vmatmul.msk.f32.gmra.mxu1 %vm496_vm12, %v386_v29 }
  0x3a   : > { %1406 = vmatmul.msk.f32.gmra.mxu3 %vm496_vm12, %v397_v30 }
  0x3d   : > { %423 = vperm.xlu2 %1505, %v401_v35  }
  0x3f   : > { %418 = vperm.xlu0 %1503, %v400_v32   ;;  %721 = vperm.xlu1 %1504, %v713_v40  }
  0x40   : > { %1385 = vmatmul.msk.f32.gmra.mxu2 %vm496_vm12, %v398_v34 }
  0x41   : > { %1374 = vmatmul.msk.f32.gmra.mxu0 %vm496_vm12, %v387_v33  ;;  %1396 = vmatmul.msk.f32.gmra.mxu1 %vm496_vm12, %v387_v33 }
  0x42   : > { %1407 = vmatmul.msk.f32.gmra.mxu3 %vm496_vm12, %v398_v34 }
  0x45   : > { %726 = vperm.xlu2 %1505, %v714_v46  }
  0x47   : > { %731 = vperm.xlu0 %1503, %v715_v38   ;;  %736 = vperm.xlu1 %1504, %v716_v43  }
  0x48   : > { %1386 = vmatmul.msk.f32.gmra.mxu2 %vm496_vm12, %v399_v37 }
  0x49   : > { %1375 = vmatmul.msk.f32.gmra.mxu0 %vm496_vm12, %v388_v36  ;;  %1397 = vmatmul.msk.f32.gmra.mxu1 %vm496_vm12, %v388_v36 }
  0x4a   : > { %1408 = vmatmul.msk.f32.gmra.mxu3 %vm496_vm12, %v399_v37 }
  0x4d   : > { %741 = vperm.xlu2 %1505, %v717_v48  }
  0x4f   : > { %746 = vperm.xlu0 %1503, %v718_v41  }
  0x51   : > { %1376 = vmatmul.msk.f32.gmra.mxu0 %vm496_vm12, %v389_v39  ;;  %1398 = vmatmul.msk.f32.gmra.mxu1 %vm496_vm12, %v389_v39 }
  0x59   : > { %1377 = vmatmul.msk.f32.gmra.mxu0 %vm496_vm12, %v390_v42  ;;  %1399 = vmatmul.msk.f32.gmra.mxu1 %vm496_vm12, %v390_v42 }
  0x61   : > { %1378 = vmatmul.msk.f32.gmra.mxu0 %vm496_vm12, %v391_v44  ;;  %1400 = vmatmul.msk.f32.gmra.mxu1 %vm496_vm12, %v391_v44 }
  0x69   : > { %1379 = vmatmul.msk.f32.gmra.mxu0 %vm496_vm12, %v392_v45  ;;  %1401 = vmatmul.msk.f32.gmra.mxu1 %vm496_vm12, %v392_v45 }
  0x71   : > { %1380 = vmatmul.msk.f32.gmra.mxu0 %vm496_vm12, %v393_v47  ;;  %1402 = vmatmul.msk.f32.gmra.mxu1 %vm496_vm12, %v393_v47 }
  0x73   : > { %v474_v24 = vpop.permute.xlu2 %473 }
  0x79   : > { %1381 = vmatmul.msk.f32.gmra.mxu0 %vm496_vm12, %v394_v49  ;;  %1403 = vmatmul.msk.f32.gmra.mxu1 %vm496_vm12, %v394_v49 }
  0x7f   : > { %v469_v37 = vpop.permute.xlu2 %468 }
  0x81   : > { %1382 = vmatmul.msk.f32.gmra.mxu0 %vm496_vm12, %v1753_v20 }
  0x87   : > { %v454_v42 = vpop.permute.xlu2 %453 }
  0x89   : > { %v494_v63 = vpop.permute.xlu0 %493  ;;  %v484_v0 = vpop.permute.xlu1 %483 }
  0x91   : > { %v489_v6 = vpop.permute.xlu0 %488  ;;  %v479_v7 = vpop.permute.xlu1 %478 }
  0x99   : > { %v464_v38 = vpop.permute.xlu0 %463  ;;  %v459_v41 = vpop.permute.xlu1 %458 }
  0xa1   : > { %v449_v43 = vpop.permute.xlu0 %448 }
  0xa6   : > { %v1885_v50 = vpop.f32.mrf.mxu0  ;;  %v1887_v51 = vpop.f32.mrf.mxu1 }
  0xad   : > { %v660_v52 = vpop.f32.mrf.mxu3 }
  0xae   : > { %v1889_v53 = vpop.f32.mrf.mxu0  ;;  %v1891_v54 = vpop.f32.mrf.mxu1  ;;  %v661_v25 = vadd.f32 %v660_v52, %v474_v24 }
  0xaf   : > { %v444_v52 = vpop.permute.xlu1 %443 }
  0xb0   : > { %v698_v30 = vmax.f32 %v661_v25, 0.0 }
  0xb3   : > { %v598_v56 = vpop.f32.mrf.mxu2 }
  0xb4   : > { %v599_v19 = vadd.f32 %v598_v56, %v479_v7 }
  0xb5   : > { %v663_v55 = vpop.f32.mrf.mxu3 }
  0xb6   : > { %v1893_v57 = vpop.f32.mrf.mxu0  ;;  %v1895_v58 = vpop.f32.mrf.mxu1  ;;  %v664_v18 = vadd.f32 %v663_v55, %v479_v7  ;;  %v699_v29 = vmax.f32 %v599_v19, 0.0 }
  0xb7   : > { %v429_v19 = vpop.permute.xlu1 %428 }
  0xb8   : > { %v700_v28 = vmax.f32 %v664_v18, 0.0 }
  0xbb   : > { %v601_v60 = vpop.f32.mrf.mxu2 }
  0xbc   : > { %v602_v13 = vadd.f32 %v601_v60, %v484_v0  ;;  %v434_v60 = vpop.permute.xlu0 %433 }
  0xbd   : > { %v666_v59 = vpop.f32.mrf.mxu3 }
  0xbe   : > { %v1897_v61 = vpop.f32.mrf.mxu0  ;;  %v1899_v62 = vpop.f32.mrf.mxu1  ;;  %v667_v12 = vadd.f32 %v666_v59, %v484_v0  ;;  %v701_v27 = vmax.f32 %v602_v13, 0.0 }
  0xbf   : > { %v439_v59 = vpop.permute.xlu2 %438  ;;  %v637_v13 = vadd.f32 %v1899_v62, %v434_v60 }
  0xc0   : > { %v702_v26 = vmax.f32 %v667_v12, 0.0 }
  0xc1   : > { %v682_v25 = vmax.f32 %v637_v13, 0.0 }
  0xc3   : > { %v604_v3 = vpop.f32.mrf.mxu2 }
  0xc4   : > { %v605_v9 = vadd.f32 %v604_v3, %v489_v6 }
  0xc5   : > { %v669_v2 = vpop.f32.mrf.mxu3 }
  0xc6   : > { %v1901_v4 = vpop.f32.mrf.mxu0  ;;  %v1903_v5 = vpop.f32.mrf.mxu1  ;;  %v670_v8 = vadd.f32 %v669_v2, %v489_v6  ;;  %v703_v22 = vmax.f32 %v605_v9, 0.0 }
  0xc7   : > { %v640_v9 = vadd.f32 %v1903_v5, %v439_v59  ;;  %v424_v5 = vpop.permute.xlu2 %423 }
  0xc8   : > { %v704_v20 = vmax.f32 %v670_v8, 0.0 }
  0xcb   : > { %v607_v11 = vpop.f32.mrf.mxu2 }
  0xcc   : > { %v608_v17 = vadd.f32 %v607_v11, %v494_v63 }
  0xcd   : > { %v672_v10 = vpop.f32.mrf.mxu3 }
  0xce   : > { %v673_v14 = vadd.f32 %v672_v10, %v494_v63  ;;  %v1905_v15 = vpop.f32.mrf.mxu0  ;;  %v642_v16 = vpop.f32.mrf.mxu1  ;;  %v705_v23 = vmax.f32 %v608_v17, 0.0 }
  0xcf   : > { %v643_v3 = vadd.f32 %v642_v16, %v444_v52  ;;  %v634_v16 = vadd.f32 %v1895_v58, %v429_v19 }
  0xd0   : > { %v706_v21 = vmax.f32 %v673_v14, 0.0  ;;  %749 = vmatpush.msrb.mxu2 %v705_v23  ;;  %v419_v23 = vpop.permute.xlu0 %418 }
  0xd1   : > { %v686_v14 = vmax.f32 %v643_v3, 0.0 }
  0xd2   : > { %784 = vmatpush.msrb.mxu3 %v706_v21  ;;  %750 = vmatpush.msrb.mxu2 %v703_v22 }
  0xd4   : > { %785 = vmatpush.msrb.mxu3 %v704_v20  ;;  %751 = vmatpush.msrb.mxu2 %v701_v27  ;;  %v684_v20 = vmax.f32 %v640_v9, 0.0  ;;  %v628_v27 = vadd.f32 %v1887_v51, %v419_v23  ;;  %v707_v51 = vld [vmem:[%s2308_s4] sm:$0xff] }
  0xd6   : > { %786 = vmatpush.msrb.mxu3 %v702_v26  ;;  %v580_v31 = vpop.f32.mrf.mxu0  ;;  %v645_v32 = vpop.f32.mrf.mxu1  ;;  %752 = vmatpush.msrb.mxu2 %v699_v29  ;;  %v578_v29 = vadd.f32 %v1905_v15, %v444_v52  ;;  %v569_v15 = vadd.f32 %v1893_v57, %v429_v19  ;;  %v1980_v19 = vld [vmem:[%s1940_s6] sm:$0xff] }
  0xd7   : > { %v646_v63 = vadd.f32 %v645_v32, %v449_v43  ;;  %v581_v26 = vadd.f32 %v580_v31, %v449_v43  ;;  %v575_v32 = vadd.f32 %v1901_v4, %v439_v59  ;;  %v566_v4 = vadd.f32 %v1889_v53, %v424_v5  ;;  %v709_v53 = vld [vmem:[%s2308_s4 + $0x10] sm:$0xff] }
  0xd8   : > { %787 = vmatpush.msrb.mxu3 %v700_v28  ;;  %v680_v28 = vmax.f32 %v634_v16, 0.0  ;;  %v685_v31 = vmax.f32 %v578_v29, 0.0  ;;  %vm841_vm12 = vcmp.ge.f32.partialorder %v1980_v19, -1.6666667  ;;  %v917_v29 = vsub.f32 -1.6666667, %v1980_v19 }
  0xd9   : > { %v688_v10 = vmax.f32 %v646_v63, 0.0 }
  0xda   : > { %788 = vmatpush.msrb.mxu3 %v698_v30 }
  0xde   : > { %v583_v33 = vpop.f32.mrf.mxu0  ;;  %v648_v34 = vpop.f32.mrf.mxu1 }
  0xdf   : > { %v649_v55 = vadd.f32 %v648_v34, %v454_v42  ;;  %v584_v21 = vadd.f32 %v583_v33, %v454_v42  ;;  %v687_v33 = vmax.f32 %v581_v26, 0.0  ;;  %v676_v34 = vmax.f32 %v628_v27, 0.0  ;;  %v1943_v42 = vld [vmem:[%s1940_s6 + $0x8] sm:$0xff] }
  0xe0   : > { %v1946_v43 = vadd.f32 3.0000002, %v1943_v42  ;;  %vm822_vm13 = vcmp.ge.f32.partialorder %v1943_v42, -3.0000002  ;;  %vm824_vm14 = vcmp.lt.f32.partialorder %v1943_v42, -2.3333335 }
  0xe1   : > { %v690_v6 = vmax.f32 %v649_v55, 0.0  ;;  %v689_v58 = vmax.f32 %v584_v21, 0.0  ;;  %vm832_vm15 = vcmp.ge.f32.partialorder %v1943_v42, -2.3333335  ;;  %vm826_vm0 = vmand %vm822_vm13, %vm824_vm14  ;;  %vm834_vm1 = vcmp.lt.f32.partialorder %v1943_v42, -1.6666667 }
  0xe2   : > { %vm842_vm2 = vcmp.ge.f32.partialorder %v1943_v42, -1.6666667  ;;  %vm844_vm3 = vcmp.lt.f32.partialorder %v1943_v42, -1.0  ;;  %vm836_vm4 = vmand %vm832_vm15, %vm834_vm1  ;;  %vm854_vm5 = vcmp.lt.f32.partialorder %v1943_v42, -0.33333334  ;;  %vm852_vm7 = vcmp.ge.f32.partialorder %v1943_v42, -1.0 }
  0xe3   : > { %vm846_vm6 = vmand %vm842_vm2, %vm844_vm3  ;;  %v932_v55 = vsub.f32 -1.0, %v1943_v42  ;;  %v1967_v59 = vadd.f32 1.6666667, %v1943_v42  ;;  %v1024_v13 = vmul.f32 0.74999994, %v1946_v43  ;;  %v1983_v16 = vadd.f32 1.0, %v1943_v42 }
  0xe4   : > { %vm856_vm8 = vmand %vm852_vm7, %vm854_vm5  ;;  %vm862_vm9 = vcmp.ge.f32.partialorder %v1943_v42, -0.33333334  ;;  %vm864_vm10 = vcmp.lt.f32.partialorder %v1943_v42, 0.33333334  ;;  %vm843_vm13 = vcmp.lt.f32.partialorder %v1980_v19, -1.0  ;;  %v931_v27 = vsub.f32 -1.0, %v1980_v19 }
  0xe5   : > { %vm866_vm11 = vmand %vm862_vm9, %vm864_vm10  ;;  %vm821_vm14 = vcmp.ge.f32.partialorder %v1980_v19, -3.0000002  ;;  %vm823_vm15 = vcmp.lt.f32.partialorder %v1980_v19, -2.3333335  ;;  %vm833_vm1 = vcmp.lt.f32.partialorder %v1980_v19, -1.6666667 }
  0xe6   : > { %v586_v35 = vpop.f32.mrf.mxu0  ;;  %v651_v36 = vpop.f32.mrf.mxu1  ;;  %vm845_vm2 = vmand %vm841_vm12, %vm843_vm13  ;;  %vm851_vm5 = vcmp.ge.f32.partialorder %v1980_v19, -1.0  ;;  %vm874_vm9 = vcmp.lt.f32.partialorder %v1943_v42, 1.0  ;;  %vm863_vm12 = vcmp.lt.f32.partialorder %v1980_v19, 0.33333334 }
  0xe7   : > { %v652_v48 = vadd.f32 %v651_v36, %v459_v41  ;;  %v587_v17 = vadd.f32 %v586_v35, %v459_v41  ;;  %v683_v35 = vmax.f32 %v575_v32, 0.0  ;;  %v712_v41 = vld [vmem:[%s2308_s4 + $0x28] sm:$0xff]  ;;  %v1094_v32 = vmul.f32 0.49999994, %v1946_v43  ;;  %vm825_vm3 = vmand %vm821_vm14, %vm823_vm15 }
  0xe8   : > { %vm882_vm14 = vcmp.ge.f32.partialorder %v1943_v42, 1.0  ;;  %vm884_vm15 = vcmp.lt.f32.partialorder %v1943_v42, 1.6666667 }
  0xe9   : > { %v692_v0 = vmax.f32 %v652_v48, 0.0  ;;  %v691_v62 = vmax.f32 %v587_v17, 0.0  ;;  %v914_v48 = vmul.f32 1.4999999, %v1946_v43 }
  0xee   : > { %v589_v39 = vpop.f32.mrf.mxu0  ;;  %v654_v40 = vpop.f32.mrf.mxu1 }
  0xef   : > { %v655_v46 = vadd.f32 %v654_v40, %v464_v38  ;;  %v590_v11 = vadd.f32 %v589_v39, %v464_v38  ;;  %v677_v38 = vmax.f32 %v566_v4, 0.0  ;;  %v708_v39 = vld [vmem:[%s2308_s4 + $0x8] sm:$0xff]  ;;  %v711_v40 = vld [vmem:[%s2308_s4 + $0x20] sm:$0xff] }
  0xf1   : > { %v694_v56 = vmax.f32 %v655_v46, 0.0  ;;  %v693_v22 = vmax.f32 %v590_v11, 0.0  ;;  %v1591_v46 = vmov 0.0  }
  0xf2   : > { %v1414_v63 = vsel %vm846_vm6, 1.0, %v1591_v46  ;;  %vm853_vm6 = vcmp.lt.f32.partialorder %v1980_v19, -0.33333334 }
  0xf3   : > { %vm855_vm7 = vmand %vm851_vm5, %vm853_vm6  ;;  %vm894_vm5 = vcmp.lt.f32.partialorder %v1943_v42, 2.3333335 }
  0xf6   : > { %v592_v44 = vpop.f32.mrf.mxu0  ;;  %v657_v45 = vpop.f32.mrf.mxu1 }
  0xf7   : > { %v658_v47 = vadd.f32 %v657_v45, %v469_v37  ;;  %v593_v7 = vadd.f32 %v592_v44, %v469_v37  ;;  %v679_v37 = vmax.f32 %v569_v15, 0.0  ;;  %v918_v44 = vsub.f32 -1.6666667, %v1943_v42 }
  0xf8   : > { %v1950_v45 = vadd.f32 2.3333335, %v1943_v42  ;;  %v1413_v15 = vsel %vm845_vm2, 1.0, %v1591_v46  ;;  %vm873_vm2 = vcmp.lt.f32.partialorder %v1980_v19, 1.0 }
  0xf9   : > { %v696_v49 = vmax.f32 %v658_v47, 0.0  ;;  %v695_v18 = vmax.f32 %v593_v7, 0.0  ;;  %v1410_v47 = vsel %vm826_vm0, 1.0, %v1591_v46  ;;  %vm831_vm0 = vcmp.ge.f32.partialorder %v1980_v19, -2.3333335 }
  0xfa   : > { %v928_v52 = vmul.f32 1.4999999, %v1950_v45 }
  0xfb   : > { %789 = vmatpush.msrb.mxu3 %v696_v49  ;;  %v920_v49 = vmul.f32 1.4999999, %v918_v44 }
  0xfd   : > { %790 = vmatpush.msrb.mxu3 %v694_v56  ;;  %v1412_v56 = vsel %vm836_vm4, 1.0, %v1591_v46  ;;  %vm835_vm4 = vmand %vm831_vm0, %vm833_vm1  ;;  %vm871_vm1 = vcmp.ge.f32.partialorder %v1980_v19, 0.33333334 }
  0xfe   : > { %v595_v2 = vpop.f32.mrf.mxu0  ;;  %v922_v3 = vmul.f32 %v1412_v56, %v920_v49  ;;  %v930_v7 = vmul.f32 %v1412_v56, %v928_v52  ;;  %vm886_vm0 = vmand %vm882_vm14, %vm884_vm15  ;;  %vm893_vm14 = vcmp.lt.f32.partialorder %v1980_v19, 2.3333335 }
  0xff   : > { %v596_v8 = vadd.f32 %v595_v2, %v474_v24  ;;  %791 = vmatpush.msrb.mxu3 %v692_v0  ;;  %v631_v24 = vadd.f32 %v1891_v54, %v424_v5  ;;  %v572_v54 = vadd.f32 %v1897_v61, %v434_v60  ;;  %v563_v61 = vadd.f32 %v1885_v50, %v419_v23  ;;  %v710_v50 = vld [vmem:[%s2308_s4 + $0x18] sm:$0xff] }
 0x100   : > { %v1970_v60 = vsub.f32 -0.33333334, %v1943_v42  ;;  %v934_v0 = vmul.f32 1.4999999, %v932_v55  ;;  %v916_v2 = vmul.f32 %v1410_v47, %v914_v48 }
 0x101   : > { %v697_v12 = vmax.f32 %v596_v8, 0.0  ;;  %792 = vmatpush.msrb.mxu3 %v690_v6  ;;  %v678_v30 = vmax.f32 %v631_v24, 0.0  ;;  %v681_v36 = vmax.f32 %v572_v54, 0.0  ;;  %v675_v57 = vmax.f32 %v563_v61, 0.0 }
 0x102   : > { %v942_v6 = vmul.f32 1.4999999, %v1967_v59  ;;  %v936_v8 = vmul.f32 %v1414_v63, %v934_v0  ;;  %v948_v9 = vmul.f32 1.5, %v1970_v60  ;;  %v924_v11 = vadd.f32 %v922_v3, %v916_v2 }
 0x103   : > { %753 = vmatpush.msrb.mxu2 %v697_v12  ;;  %793 = vmatpush.msrb.mxu3 %v688_v10  ;;  %v1416_v10 = vsel %vm856_vm8, 1.0, %v1591_v46  ;;  %v1038_v5 = vmul.f32 0.74999994, %v1970_v60  ;;  %v2016_v61 = vadd.f32 1.6666667, %v1980_v19 }
 0x104   : > { %v944_v12 = vmul.f32 %v1414_v63, %v942_v6  ;;  %v938_v17 = vadd.f32 %v936_v8, %v930_v7  ;;  %v1026_v21 = vmul.f32 %v1024_v13, %v924_v11  ;;  %vm872_vm8 = vcmp.ge.f32.partialorder %v1943_v42, 0.33333334 }
 0x105   : > { %754 = vmatpush.msrb.mxu2 %v695_v18  ;;  %794 = vmatpush.msrb.mxu3 %v686_v14  ;;  %v1028_v14 = vmul.f32 0.74999994, %v932_v55  ;;  %v950_v18 = vmul.f32 %v1416_v10, %v948_v9  ;;  %v941_v52 = vmul.f32 1.4999999, %v2016_v61  ;;  %vm876_vm10 = vmand %vm872_vm8, %vm874_vm9  ;;  %v2039_v63 = vsub.f32 1.0, %v1943_v42 }
 0x106   : > { %v1104_v2 = vmul.f32 0.49999997, %v1950_v45  ;;  %v1415_v6 = vsel %vm855_vm7, 1.0, %v1591_v46  ;;  %v1420_v13 = vsel %vm876_vm10, 1.0, %v1591_v46  ;;  %vm881_vm7 = vcmp.ge.f32.partialorder %v1980_v19, 1.0 }
 0x107   : > { %755 = vmatpush.msrb.mxu2 %v693_v22  ;;  %795 = vmatpush.msrb.mxu3 %v684_v20  ;;  %v960_v20 = vsub.f32 0.33333334, %v1943_v42  ;;  %v1034_v22 = vmul.f32 0.74999994, %v1950_v45  ;;  %v952_v23 = vadd.f32 %v950_v18, %v944_v12  ;;  %v1030_v24 = vmul.f32 %v1028_v14, %v938_v17 }
 0x108   : > { %v976_v9 = vmul.f32 1.5, %v2039_v63  ;;  %v1027_v12 = vmul.f32 0.74999994, %v931_v27  ;;  %vm883_vm8 = vcmp.lt.f32.partialorder %v1980_v19, 1.6666667 }
 0x109   : > { %756 = vmatpush.msrb.mxu2 %v691_v62  ;;  %796 = vmatpush.msrb.mxu3 %v682_v25  ;;  %v956_v25 = vmul.f32 1.5, %v1983_v16  ;;  %v962_v26 = vmul.f32 1.5, %v960_v20  ;;  %v1994_v62 = vsel %vm866_vm11, 1.0, %v1591_v46  ;;  %v1032_v54 = vadd.f32 %v1030_v24, %v1026_v21  ;;  %vm885_vm9 = vmand %vm881_vm7, %vm883_vm8 }
 0x10a   : > { %v1108_v3 = vmul.f32 0.49999997, %v960_v20  ;;  %vm861_vm11 = vcmp.ge.f32.partialorder %v1980_v19, -0.33333334  ;;  %v2053_v21 = vadd.f32 1.0, %v1980_v19  ;;  %v978_v24 = vmul.f32 %v1420_v13, %v976_v9 }
 0x10b   : > { %757 = vmatpush.msrb.mxu2 %v689_v58  ;;  %797 = vmatpush.msrb.mxu3 %v680_v28  ;;  %v2000_v28 = vadd.f32 3.0000002, %v1980_v19  ;;  %v1036_v58 = vmul.f32 %v1034_v22, %v938_v17  ;;  %vm865_vm13 = vmand %vm861_vm11, %vm863_vm12  ;;  %v2056_v22 = vsub.f32 0.33333334, %v1980_v19  ;;  %vm902_vm10 = vcmp.ge.f32.partialorder %v1943_v42, 2.3333335 }
 0x10c   : > { %vm904_vm11 = vcmp.lt.f32.partialorder %v1943_v42, 3.0000002 }
 0x10d   : > { %758 = vmatpush.msrb.mxu2 %v687_v33  ;;  %798 = vmatpush.msrb.mxu3 %v678_v30  ;;  %v1040_v30 = vmul.f32 %v1038_v5, %v952_v23  ;;  %v2005_v33 = vadd.f32 2.3333335, %v1980_v19  ;;  %v913_v4 = vmul.f32 1.4999999, %v2000_v28  ;;  %v1023_v11 = vmul.f32 0.74999994, %v2000_v28  ;;  %vm906_vm12 = vmand %vm902_vm10, %vm904_vm11 }
 0x10e   : > { %vm1248_vm11 = vcmask 1040384  }
 0x10f   : > { %759 = vmatpush.msrb.mxu2 %v685_v31  ;;  %799 = vmatpush.msrb.mxu3 %v676_v34  ;;  %v958_v31 = vmul.f32 %v1416_v10, %v956_v25  ;;  %v964_v34 = vmul.f32 %v1994_v62, %v962_v26  ;;  %v943_v10 = vmul.f32 %v1413_v15, %v941_v52  ;;  %v1417_v25 = vsel %vm865_vm13, 1.0, %v1591_v46 }
 0x110   : > { %800 = vmatmul.f32.vlgmr.msrb.gmra.mxu3 %v707_v51  ;;  %v1033_v26 = vmul.f32 0.74999994, %v2005_v33  ;;  %v2088_v52 = vadd.f32 0.33333334, %v1980_v19  ;;  %vm891_vm13 = vcmp.ge.f32.partialorder %v1980_v19, 1.6666667 }
 0x111   : > { %760 = vmatpush.msrb.mxu2 %v683_v35  ;;  %v933_v35 = vmul.f32 1.4999999, %v931_v27  ;;  %v2025_v43 = vadd.f32 %v964_v34, %v958_v31  ;;  %v955_v27 = vmul.f32 1.5, %v2053_v21  ;;  %vm895_vm15 = vmand %vm891_vm13, %vm893_vm14 }
 0x113   : > { %761 = vmatpush.msrb.mxu2 %v681_v36  ;;  %v919_v36 = vmul.f32 1.4999999, %v917_v29  ;;  %v935_v47 = vmul.f32 %v1413_v15, %v933_v35  ;;  %v961_v29 = vmul.f32 1.5, %v2056_v22  ;;  %v957_v31 = vmul.f32 %v1415_v6, %v955_v27 }
 0x114   : > { %v1054_v15 = vmul.f32 0.75, %v1983_v16  ;;  %v1058_v35 = vmul.f32 0.75, %v2039_v63 }
 0x115   : > { %762 = vmatpush.msrb.mxu2 %v679_v37  ;;  %v1409_v37 = vsel %vm825_vm3, 1.0, %v1591_v46  ;;  %v963_v34 = vmul.f32 %v1417_v25, %v961_v29  ;;  %vm875_vm3 = vmand %vm871_vm1, %vm873_vm2  ;;  %v1107_v29 = vmul.f32 0.49999997, %v2056_v22  ;;  %vm903_vm1 = vcmp.lt.f32.partialorder %v1980_v19, 3.0000002 }
 0x116   : > { %v915_v48 = vmul.f32 %v1409_v37, %v913_v4  ;;  %v2072_v4 = vsub.f32 1.6666667, %v1943_v42 }
 0x117   : > { %763 = vmatpush.msrb.mxu2 %v677_v38  ;;  %v1411_v38 = vsel %vm835_vm4, 1.0, %v1591_v46  ;;  %vm892_vm4 = vcmp.ge.f32.partialorder %v1943_v42, 1.6666667 }
 0x118   : > { %803 = vmatmul.f32.gmra.mxu3 %v708_v39  ;;  %v921_v49 = vmul.f32 %v1411_v38, %v919_v36  ;;  %vm896_vm6 = vmand %vm892_vm4, %vm894_vm5 }
 0x119   : > { %764 = vmatpush.msrb.mxu2 %v675_v57  ;;  %v2022_v57 = vsub.f32 -0.33333334, %v1980_v19 }
 0x11a   : > { %765 = vmatmul.f32.vlgmr.msrb.gmra.mxu2 %v707_v51  ;;  %v1044_v51 = vmul.f32 0.74999994, %v1967_v59  ;;  %v923_v14 = vadd.f32 %v921_v49, %v915_v48  ;;  %v1047_v48 = vmul.f32 0.75, %v2056_v22  ;;  %v1056_v49 = vmul.f32 %v1054_v15, %v2025_v43 }
 0x11b   : > { %v947_v56 = vmul.f32 1.5, %v2022_v57  ;;  %v1053_v15 = vmul.f32 0.75, %v2053_v21 }
 0x11c   : > { %v1046_v44 = vmul.f32 %v1044_v51, %v952_v23 }
 0x11d   : > { %v949_v45 = vmul.f32 %v1415_v6, %v947_v56  ;;  %v1114_v56 = vmul.f32 0.49999997, %v1967_v59 }
 0x120   : > { %806 = vmatmul.f32.gmra.mxu3 %v709_v53 }
 0x122   : > { %768 = vmatmul.f32.gmra.mxu2 %v708_v39  ;;  %v927_v39 = vmul.f32 1.4999999, %v2005_v33 }
 0x124   : > { %v929_v55 = vmul.f32 %v1411_v38, %v927_v39  ;;  %v1093_v38 = vmul.f32 0.49999994, %v2000_v28 }
 0x126   : > { %v937_v17 = vadd.f32 %v935_v47, %v929_v55  ;;  %v1043_v47 = vmul.f32 0.74999994, %v2016_v61 }
 0x128   : > { %809 = vmatmul.f32.gmra.mxu3 %v710_v50  ;;  %v1035_v37 = vmul.f32 %v1033_v26, %v937_v17 }
 0x12a   : > { %771 = vmatmul.f32.gmra.mxu2 %v709_v53  ;;  %v1042_v53 = vadd.f32 %v1040_v30, %v1036_v58  ;;  %v951_v58 = vadd.f32 %v949_v45, %v943_v10  ;;  %v1025_v30 = vmul.f32 %v1023_v11, %v923_v14  ;;  %v2101_v11 = vsel %vm875_vm3, 1.0, %v1591_v46 }
 0x12b   : > { %v1118_v14 = vmul.f32 0.5, %v2039_v63  ;;  %v2113_v63 = vadd.f32 -1.0, %v1943_v42 }
 0x12c   : > { %v1045_v9 = vmul.f32 %v1043_v47, %v951_v58 }
 0x130   : > { %812 = vmatmul.f32.gmra.mxu3 %v711_v40 }
 0x132   : > { %774 = vmatmul.f32.gmra.mxu2 %v710_v50  ;;  %v1096_v50 = vmul.f32 %v1094_v32, %v1032_v54  ;;  %v1029_v32 = vmul.f32 %v1027_v12, %v937_v17  ;;  %v1037_v54 = vmul.f32 0.74999994, %v2022_v57  ;;  %v1103_v17 = vmul.f32 0.49999997, %v2005_v33 }
 0x133   : > { %v2116_v33 = vsub.f32 2.3333335, %v1943_v42 }
 0x138   : > { %815 = vmatmul.f32.gmra.mxu3 %v712_v41 }
 0x13a   : > { %777 = vmatmul.f32.gmra.mxu2 %v711_v40  ;;  %v1098_v40 = vmul.f32 0.49999997, %v1970_v60  ;;  %v2036_v60 = vadd.f32 0.33333334, %v1943_v42 }
 0x13c   : > { %v1100_v0 = vmul.f32 %v1098_v40, %v1042_v53  ;;  %v970_v8 = vmul.f32 1.5, %v2036_v60  ;;  %v990_v40 = vmul.f32 1.4999999, %v2072_v4 }
 0x13e   : > { %v2050_v18 = vadd.f32 %v1100_v0, %v1096_v50  ;;  %v972_v23 = vmul.f32 %v1994_v62, %v970_v8  ;;  %v2067_v62 = vadd.f32 -0.33333334, %v1943_v42  ;;  %v2077_v50 = vsel %vm886_vm0, 1.0, %v1591_v46 }
 0x13f   : > { %v969_v8 = vmul.f32 1.5, %v2088_v52  ;;  %vm901_vm0 = vcmp.ge.f32.partialorder %v1980_v19, 2.3333335 }
 0x140   : > { %v980_v51 = vadd.f32 %v978_v24, %v972_v23  ;;  %v984_v39 = vmul.f32 1.5, %v2067_v62  ;;  %v1068_v23 = vmul.f32 0.74999994, %v2072_v4  ;;  %vm905_vm2 = vmand %vm901_vm0, %vm903_vm1 }
 0x141   : > { %v971_v24 = vmul.f32 %v1417_v25, %v969_v8  ;;  %v1124_v25 = vmul.f32 0.5, %v1983_v16 }
 0x142   : > { %780 = vmatmul.f32.gmra.mxu2 %v712_v41  ;;  %v1048_v41 = vmul.f32 0.75, %v960_v20  ;;  %v1106_v20 = vmul.f32 %v1104_v2, %v1042_v53  ;;  %v1031_v53 = vadd.f32 %v1029_v32, %v1025_v30  ;;  %v1060_v28 = vmul.f32 %v1058_v35, %v980_v51  ;;  %v722_v32 = vpop.permute.xlu1 %721 }
 0x143   : > { %v986_v0 = vmul.f32 %v1420_v13, %v984_v39  ;;  %v992_v2 = vmul.f32 %v2077_v50, %v990_v40  ;;  %v1113_v35 = vmul.f32 0.49999997, %v2016_v61  ;;  %v1004_v39 = vmul.f32 1.4999999, %v2116_v33 }
 0x144   : > { %v1050_v7 = vmul.f32 %v1048_v41, %v2025_v43  ;;  %v1039_v41 = vmul.f32 %v1037_v54, %v951_v58  ;;  %v1097_v43 = vmul.f32 0.49999997, %v2022_v57  ;;  %v1062_v13 = vadd.f32 %v1060_v28, %v1056_v49 }
 0x145   : > { %v1064_v57 = vmul.f32 0.75, %v2036_v60  ;;  %v2136_v40 = vadd.f32 -0.33333334, %v1980_v19  ;;  %v1128_v28 = vmul.f32 0.49999997, %v2072_v4 }
 0x146   : > { %v1052_v5 = vadd.f32 %v1050_v7, %v1046_v44  ;;  %v2081_v44 = vadd.f32 %v963_v34, %v957_v31  ;;  %v1095_v7 = vmul.f32 %v1093_v38, %v1031_v53  ;;  %v1041_v12 = vadd.f32 %v1039_v41, %v1035_v37 }
 0x147   : > { %v1120_v58 = vmul.f32 %v1118_v14, %v1062_v13  ;;  %v1066_v31 = vmul.f32 %v1064_v57, %v980_v51  ;;  %v998_v51 = vmul.f32 1.4999999, %v2113_v63  ;;  %v1424_v53 = vsel %vm896_vm6, 1.0, %v1591_v46 }
 0x148   : > { %v1110_v36 = vmul.f32 %v1108_v3, %v1052_v5  ;;  %v2093_v3 = vsub.f32 1.0, %v1980_v19  ;;  %v1049_v10 = vmul.f32 %v1047_v48, %v2081_v44  ;;  %v1116_v45 = vmul.f32 %v1114_v56, %v1052_v5 }
 0x149   : > { %v1099_v5 = vmul.f32 %v1097_v43, %v1041_v12  ;;  %v1105_v30 = vmul.f32 %v1103_v17, %v1041_v12  ;;  %v2139_v41 = vsub.f32 1.6666667, %v1980_v19  ;;  %v1126_v49 = vmul.f32 %v1124_v25, %v1062_v13  ;;  %v2155_v12 = vpop.permute.xlu2 %726 }
 0x14a   : > { %v2095_v6 = vadd.f32 %v1110_v36, %v1106_v20  ;;  %v975_v59 = vmul.f32 1.5, %v2093_v3  ;;  %v994_v20 = vadd.f32 %v992_v2, %v986_v0  ;;  %v1051_v27 = vadd.f32 %v1049_v10, %v1045_v9 }
 0x14b   : > { %v1057_v37 = vmul.f32 0.75, %v2093_v3  ;;  %v2132_v61 = vadd.f32 %v1099_v5, %v1095_v7  ;;  %v2141_v47 = vadd.f32 %v1120_v58, %v1116_v45  ;;  %v1055_v56 = vmul.f32 %v1053_v15, %v2081_v44 }
 0x14c   : > { %v977_v26 = vmul.f32 %v2101_v11, %v975_v59  ;;  %v1070_v34 = vmul.f32 %v1068_v23, %v994_v20  ;;  %v1109_v38 = vmul.f32 %v1107_v29, %v1051_v27  ;;  %v1074_v2 = vmul.f32 0.74999994, %v2067_v62 }
 0x14d   : > { %v1115_v43 = vmul.f32 %v1113_v35, %v1051_v27  ;;  %v1000_v8 = vmul.f32 %v2077_v50, %v998_v51  ;;  %v1006_v9 = vmul.f32 %v1424_v53, %v1004_v39  ;;  %v1134_v10 = vmul.f32 0.49999997, %v2036_v60 }
 0x14e   : > { %v2125_v36 = vadd.f32 %v977_v26, %v971_v24  ;;  %v1072_v48 = vadd.f32 %v1070_v34, %v1066_v31  ;;  %v2148_v7 = vadd.f32 %v1109_v38, %v1105_v30  ;;  %v1421_v59 = vsel %vm885_vm9, 1.0, %v1591_v46 }
 0x14f   : > { %v983_v4 = vmul.f32 1.5, %v2136_v40  ;;  %v1442_v50 = vadd.f32 -1.6666667, %v1943_v42  ;;  %v1117_v17 = vmul.f32 0.5, %v2093_v3  ;;  %v1076_v45 = vmul.f32 %v1074_v2, %v994_v20 }
 0x150   : > { %v1059_v0 = vmul.f32 %v1057_v37, %v2125_v36  ;;  %v1130_v13 = vmul.f32 %v1128_v28, %v1072_v48  ;;  %v1008_v23 = vadd.f32 %v1006_v9, %v1000_v8  ;;  %v1078_v24 = vmul.f32 0.74999994, %v2116_v33 }
 0x151   : > { %v1012_v26 = vmul.f32 1.4999999, %v1442_v50  ;;  %v1016_v27 = vsub.f32 3.0000002, %v1943_v42  ;;  %v2170_v29 = vmul.f32 %v1134_v10, %v1072_v48  ;;  %v985_v5 = vmul.f32 %v2101_v11, %v983_v4 }
 0x152   : > { %v2163_v60 = vadd.f32 %v1059_v0, %v1055_v56  ;;  %v1426_v30 = vsel %vm906_vm12, 1.0, %v1591_v46  ;;  %v2174_v25 = vadd.f32 %v1130_v13, %v1126_v49  ;;  %v1063_v35 = vmul.f32 0.75, %v2088_v52 }
 0x153   : > { %v1014_v3 = vmul.f32 %v1424_v53, %v1012_v26  ;;  %v1018_v20 = vmul.f32 1.4999999, %v1016_v27  ;;  %v1067_v11 = vmul.f32 0.74999994, %v2139_v41  ;;  %v1444_v38 = vmul.f32 -1.442695, %v1943_v42 }
 0x154   : > { %v1119_v15 = vmul.f32 %v1117_v17, %v2163_v60  ;;  %v1084_v39 = vmul.f32 0.74999994, %v2113_v63  ;;  %v1088_v53 = vmul.f32 0.74999994, %v1016_v27  ;;  %v1138_v28 = vmul.f32 0.49999997, %v2116_v33 }
 0x155   : > { %v1020_v37 = vmul.f32 %v1426_v30, %v1018_v20  ;;  %1506 = vpow2.f32 %v1444_v38  ;;  %v1001_v63 = vsub.f32 2.3333335, %v1980_v19  ;;  %v1065_v8 = vmul.f32 %v1063_v35, %v2125_v36 }
 0x156   : > { %v2195_v0 = vadd.f32 %v1119_v15, %v1115_v43  ;;  %v1423_v9 = vsel %vm895_vm15, 1.0, %v1591_v46  ;;  %v1086_v10 = vmul.f32 %v1084_v39, %v1008_v23  ;;  %v1127_v33 = vmul.f32 0.49999997, %v2139_v41 }
 0x157   : > { %v1022_v49 = vadd.f32 %v1020_v37, %v1014_v3  ;;  %v1144_v50 = vmul.f32 0.49999997, %v2067_v62  ;;  %v1148_v17 = vmul.f32 0.49999994, %v1016_v27  ;;  %v1015_v62 = vsub.f32 3.0000002, %v1980_v19  ;;  %v737_v27 = vpop.permute.xlu1 %736 }
 0x158   : > { %vm1253_vm12 = vcmp.lt.s32.totalorder %v338_v1, 256 }
 0x159   : > { %v1090_v4 = vmul.f32 %v1088_v53, %v1022_v49  ;;  %v1133_v49 = vmul.f32 0.49999997, %v2088_v52 }
 0x15b   : > { %v1507_v36 = vpop.eup %1506 }
 0x15c   : > { %v2207_v26 = vadd.f32 1.0, %v1507_v36 }
 0x15e   : > { %1508 = vrcp.f32 %v2207_v26  ;;  %vm1215_vm3 = vweird.f32 %v2207_v26 }
 0x193   : > { %v801_v55 = vpop.f32.mrf.mxu3 }
 0x194   : > { %v802_v22 = vadd.f32 %v801_v55, %v722_v32 }
 0x196   : > { %v1154_v55 = vmul.f32 %v2050_v18, %v802_v22  ;;  %v989_v18 = vmul.f32 1.4999999, %v2139_v41  ;;  %v1080_v22 = vmul.f32 %v1078_v24, %v1008_v23  ;;  %v1077_v24 = vmul.f32 0.74999994, %v1001_v63 }
 0x198   : > { %v991_v58 = vmul.f32 %v1421_v59, %v989_v18  ;;  %v1082_v2 = vadd.f32 %v1080_v22, %v1076_v45  ;;  %v1003_v18 = vmul.f32 1.4999999, %v1001_v63  ;;  %v1073_v45 = vmul.f32 0.74999994, %v2136_v40 }
 0x19a   : > { %v993_v51 = vadd.f32 %v991_v58, %v985_v5  ;;  %v1005_v43 = vmul.f32 %v1423_v9, %v1003_v18  ;;  %v1140_v58 = vmul.f32 %v1138_v28, %v1082_v2  ;;  %v1146_v39 = vmul.f32 %v1144_v50, %v1082_v2 }
 0x19b   : > { %v804_v54 = vpop.f32.mrf.mxu3  ;;  %v1443_v2 = vmul.f32 -1.442695, %v1980_v19  ;;  %v1147_v50 = vmul.f32 0.49999994, %v1015_v62 }
 0x19c   : > { %v805_v14 = vadd.f32 %v804_v54, %v2155_v12  ;;  %v2177_v54 = vadd.f32 -1.0, %v1980_v19  ;;  %v1069_v13 = vmul.f32 %v1067_v11, %v993_v51  ;;  %v1017_v11 = vmul.f32 1.4999999, %v1015_v62 }
 0x19d   : > { %v766_v16 = vpop.f32.mrf.mxu2  ;;  %1510 = vpow2.f32 %v1443_v2 }
 0x19e   : > { %v1156_v31 = vmul.f32 %v2095_v6, %v805_v14  ;;  %v767_v34 = vadd.f32 %v766_v16, %v722_v32  ;;  %v997_v6 = vmul.f32 1.4999999, %v2177_v54  ;;  %v732_v14 = vpop.permute.xlu0 %731  ;;  %v1071_v30 = vadd.f32 %v1069_v13, %v1065_v8 }
 0x19f   : > { %v1083_v37 = vmul.f32 0.74999994, %v2177_v54  ;;  %v1221_v13 = vand.u32 2147483648, %v2207_v26 }
 0x1a0   : > { %v2188_v32 = vadd.f32 %v1156_v31, %v1154_v55  ;;  %v2191_v16 = vmul.f32 %v2132_v61, %v767_v34  ;;  %v999_v55 = vmul.f32 %v1421_v59, %v997_v6  ;;  %v1123_v61 = vmul.f32 0.5, %v2053_v21 }
 0x1a1   : > { %v1441_v59 = vadd.f32 -1.6666667, %v1980_v19  ;;  %v1092_v21 = vadd.f32 %v1090_v4, %v1086_v10  ;;  %v1075_v31 = vmul.f32 %v1073_v45, %v993_v51  ;;  %v1425_v34 = vsel %vm905_vm2, 1.0, %v1591_v46  ;;  %v742_v10 = vpop.permute.xlu2 %741 }
 0x1a2   : > { %v1007_v41 = vadd.f32 %v1005_v43, %v999_v55  ;;  %v1125_v3 = vmul.f32 %v1123_v61, %v2163_v60  ;;  %v1019_v51 = vmul.f32 %v1425_v34, %v1017_v11  ;;  %v1087_v6 = vmul.f32 0.74999994, %v1015_v62  ;;  %v1509_v55 = vpop.eup %1508 }
 0x1a3   : > { %v2157_v44 = vpop.f32.mrf.mxu3  ;;  %v1011_v20 = vmul.f32 1.4999999, %v1441_v59  ;;  %v1150_v53 = vmul.f32 %v1148_v17, %v1092_v21  ;;  %v1129_v28 = vmul.f32 %v1127_v33, %v1071_v30  ;;  %v1143_v33 = vmul.f32 0.49999997, %v2136_v40 }
 0x1a4   : > { %v808_v23 = vadd.f32 %v2157_v44, %v732_v14  ;;  %v1079_v35 = vmul.f32 %v1077_v24, %v1007_v41  ;;  %vm1216_vm4 = vweird.f32 %v1509_v55 }
 0x1a5   : > { %v2166_v57 = vpop.f32.mrf.mxu2  ;;  %v1013_v22 = vmul.f32 %v1423_v9, %v1011_v20  ;;  %v1137_v9 = vmul.f32 0.49999997, %v1001_v63  ;;  %v1152_v18 = vadd.f32 %v1150_v53, %v1146_v39  ;;  %v1131_v59 = vadd.f32 %v1129_v28, %v1125_v3  ;;  %vm2231_vm5 = vmor %vm1215_vm3, %vm1216_vm4 }
 0x1a6   : > { %v1160_v38 = vmul.f32 %v2141_v47, %v808_v23  ;;  %v770_v60 = vadd.f32 %v2166_v57, %v2155_v12  ;;  %v1081_v8 = vadd.f32 %v1079_v35, %v1075_v31  ;;  %v1085_v47 = vmul.f32 %v1083_v37, %v1007_v41  ;;  %v747_v61 = vpop.permute.xlu0 %746 }
 0x1a7   : > { %v1021_v4 = vadd.f32 %v1019_v51, %v1013_v22  ;;  %v1135_v12 = vmul.f32 %v1133_v49, %v1071_v30 }
 0x1a8   : > { %v1162_v36 = vadd.f32 %v1160_v38, %v2188_v32  ;;  %v1155_v23 = vmul.f32 %v2148_v7, %v770_v60  ;;  %v1145_v20 = vmul.f32 %v1143_v33, %v1081_v8 }
 0x1a9   : > { %v1089_v63 = vmul.f32 %v1087_v6, %v1021_v4 }
 0x1ab   : > { %v810_v48 = vpop.f32.mrf.mxu3  ;;  %v1091_v45 = vadd.f32 %v1089_v63, %v1085_v47 }
 0x1ac   : > { %v811_v44 = vadd.f32 %v810_v48, %v737_v27  ;;  %v1142_v48 = vadd.f32 %v1140_v58, %v2170_v29  ;;  %v1211_v29 = vmul.f32 %v1509_v55, %v2207_v26  ;;  %v1222_v58 = vor.u32 1.1754944e-38, %v1221_v13 }
 0x1ad   : > { %v772_v56 = vpop.f32.mrf.mxu2 }
 0x1ae   : > { %v1164_v46 = vmul.f32 %v2174_v25, %v811_v44  ;;  %v773_v54 = vadd.f32 %v772_v56, %v732_v14  ;;  %v1219_v25 = vand.u32 2147483647, %v2207_v26  ;;  %v1139_v56 = vmul.f32 %v1137_v9, %v1081_v8 }
 0x1af   : > { %v1212_v17 = vsub.f32 1.0, %v1211_v29  ;;  %v1149_v44 = vmul.f32 %v1147_v50, %v1091_v45 }
 0x1b0   : > { %v1159_v21 = vmul.f32 %v2195_v0, %v773_v54  ;;  %v1141_v30 = vadd.f32 %v1139_v56, %v1135_v12  ;;  %v1166_v32 = vadd.f32 %v1164_v46, %v1162_v36  ;;  %vm1220_vm6 = vcmp.eq.f32.partialorder %v1219_v25, 8.507059e+37 }
 0x1b1   : > { %v1157_v0 = vadd.f32 %v1155_v23, %v2191_v16  ;;  %v1151_v37 = vadd.f32 %v1149_v44, %v1145_v20  ;;  %v1240_v36 = vstv %s1239_s30 }
 0x1b3   : > { %v813_v5 = vpop.f32.mrf.mxu3  ;;  %v1161_v35 = vadd.f32 %v1159_v21, %v1157_v0 }
 0x1b4   : > { %v814_v52 = vadd.f32 %v813_v5, %v742_v10  ;;  %v1213_v5 = vmul.f32 %v1509_v55, %v1212_v17 }
 0x1b5   : > { %v775_v15 = vpop.f32.mrf.mxu2 }
 0x1b6   : > { %v776_v24 = vadd.f32 %v775_v15, %v737_v27  ;;  %v1168_v41 = vmul.f32 %v1142_v48, %v814_v52  ;;  %v1214_v7 = vadd.f32 %v1509_v55, %v1213_v5  ;;  %v1511_v27 = vpop.eup %1510 }
 0x1b7   : > { %v1193_v15 = vadd.f32 1.0, %v1511_v27 }
 0x1b8   : > { %v1163_v3 = vmul.f32 %v1131_v59, %v776_v24  ;;  %v1170_v34 = vadd.f32 %v1168_v41, %v1166_v32  ;;  %v1218_v26 = vsel %vm2231_vm5, %v1509_v55, %v1214_v7 }
 0x1b9   : > { %v1223_v22 = vsel %vm1220_vm6, %v1222_v58, %v1218_v26  ;;  %1512 = vrcp.f32 %v1193_v15  ;;  %vm1200_vm7 = vweird.f32 %v1193_v15  ;;  %v1204_v54 = vand.u32 2147483647, %v1193_v15 }
 0x1ba   : > { %v1226_v39 = vmul.f32 %v1223_v22, %v1943_v42  ;;  %v1165_v49 = vadd.f32 %v1163_v3, %v1161_v35  ;;  %v1206_v4 = vand.u32 2147483648, %v1193_v15 }
 0x1bb   : > { %v816_v57 = vpop.f32.mrf.mxu3  ;;  %vm1205_vm10 = vcmp.eq.f32.partialorder %v1204_v54, 8.507059e+37 }
 0x1bc   : > { %v817_v14 = vadd.f32 %v816_v57, %v747_v61  ;;  %v1233_v48 = vrot.slane %v1226_v39, 4 }
 0x1bd   : > { %v778_v43 = vpop.f32.mrf.mxu2 }
 0x1be   : > { %v779_v62 = vadd.f32 %v778_v43, %v742_v10  ;;  %v1172_v31 = vmul.f32 %v1152_v18, %v817_v14  ;;  %v1234_v46 = vadd.f32 %v1233_v48, %v1226_v39  ;;  %v1207_v18 = vor.u32 1.1754944e-38, %v1206_v4 }
 0x1bf   : > { %v1513_v8 = vpop.eup %1512 }
 0x1c0   : > { %v1167_v11 = vmul.f32 %v1141_v30, %v779_v62  ;;  %v1174_v38 = vadd.f32 %v1172_v31, %v1170_v34  ;;  %v1196_v9 = vmul.f32 %v1513_v8, %v1193_v15  ;;  %v1235_v47 = vrot.slane %v1234_v46, 2 }
 0x1c1   : > { %vm1201_vm8 = vweird.f32 %v1513_v8 }
 0x1c2   : > { %v1169_v51 = vadd.f32 %v1167_v11, %v1165_v49  ;;  %v1181_v6 = vrot.slane %v1174_v38, 4  ;;  %v1197_v55 = vsub.f32 1.0, %v1196_v9  ;;  %vm1202_vm9 = vmor %vm1200_vm7, %vm1201_vm8  ;;  %v1236_v12 = vadd.f32 %v1235_v47, %v1234_v46 }
 0x1c4   : > { %v1182_v10 = vadd.f32 %v1181_v6, %v1174_v38  ;;  %v1198_v42 = vmul.f32 %v1513_v8, %v1197_v55 }
 0x1c5   : > { %v781_v53 = vpop.f32.mrf.mxu2 }
 0x1c6   : > { %v782_v60 = vadd.f32 %v781_v53, %v747_v61  ;;  %v1183_v52 = vrot.slane %v1182_v10, 2  ;;  %v1199_v29 = vadd.f32 %v1513_v8, %v1198_v42  ;;  %v1237_v61 = vrot.slane %v1236_v12, 1 }
 0x1c8   : > { %v1171_v16 = vmul.f32 %v1151_v37, %v782_v60  ;;  %v1203_v25 = vsel %vm1202_vm9, %v1513_v8, %v1199_v29  ;;  %v1184_v63 = vadd.f32 %v1183_v52, %v1182_v10  ;;  %v1238_v17 = vadd.f32 %v1237_v61, %v1236_v12 }
 0x1c9   : > { %v1208_v13 = vsel %vm1205_vm10, %v1207_v18, %v1203_v25 }
 0x1ca   : > { %v1173_v28 = vadd.f32 %v1171_v16, %v1169_v51  ;;  %v1225_v33 = vmul.f32 %v1208_v13, %v1980_v19  ;;  %v1185_v14 = vrot.slane %v1184_v63, 1  ;;  %v1242_v59 = vmul.f32 %v1240_v36, %v1238_v17 }
 0x1cc   : > { %v1175_v2 = vrot.slane %v1173_v28, 4  ;;  %v1227_v50 = vrot.slane %v1225_v33, 4  ;;  %v1186_v24 = vadd.f32 %v1185_v14, %v1184_v63 }
 0x1ce   : > { %v1176_v57 = vadd.f32 %v1175_v2, %v1173_v28  ;;  %v1228_v45 = vadd.f32 %v1227_v50, %v1225_v33  ;;  %v1244_v58 = vadd.f32 %v1242_v59, %v1186_v24 }
 0x1d0   : > { %v1177_v56 = vrot.slane %v1176_v57, 2  ;;  %v1229_v23 = vrot.slane %v1228_v45, 2  ;;  %v1247_v30 = vrot.slane %v1244_v58, 7 }
 0x1d2   : > { %v1178_v43 = vadd.f32 %v1177_v56, %v1176_v57  ;;  %v1230_v41 = vadd.f32 %v1229_v23, %v1228_v45 }
 0x1d4   : > { %v1179_v21 = vrot.slane %v1178_v43, 1  ;;  %v1231_v5 = vrot.slane %v1230_v41, 1 }
 0x1d6   : > { %v1180_v40 = vadd.f32 %v1179_v21, %v1178_v43  ;;  %v1232_v62 = vadd.f32 %v1231_v5, %v1230_v41 }
 0x1d8   : > { %v1241_v19 = vmul.f32 %v1240_v36, %v1232_v62 }
 0x1d9   : > { %1263 = sbr.rel (!%p1671_p5) target bundleno = 507 (0x1fb), region = 52 }
 0x1da   : > { %v1243_v20 = vadd.f32 %v1241_v19, %v1180_v40 }
 0x1dc   : > { %v1249_v44 = vsel %vm1248_vm11, %v1243_v20, %v1247_v30 }
 0x1dd   : > { %1255 = vst.msk [vmem:[%s308_s10] sm:$0x3] %vm1253_vm12, %v1249_v44 }
 0x1de   : > { %s2321_s15 = smov (!%p1266_p11, %s1265_s15), 2 }
 0x1df   : > { %s1268_s17 = ssub.s32 2, %s2321_s15 }
 0x1e0   : > { %s1269_s18 = sshll.u32 %s1268_s17, 4 }
 0x1e1   : > { %1270 = vsyncadd %s2245_s14, %s1269_s18  ;;  %p1447_p12 = scmp.ne.s32.totalorder %s2321_s15, 0  ;;  %s1272_s12 = scalar_lea.hbm %s2311_s7, %s1684_s16 }
 0x1e2   : > { %s1273_s22 = sshll.u32 %s2321_s15, 4  ;;  %s2260_s23 = sshll.u32 %s308_s10, 4  ;;  %s1275_s23 = int_to_ptr.vmem [resolvable:$true] %s2260_s23 }
 0x1e3   : > { %s2263_s24 = sshll.u32 %s1272_s12, 4  ;;  %s1514_s25 = sshra.s32 %s1275_s23, 4  ;;  %s1277_s24 = int_to_ptr.hbm [resolvable:$true] %s2263_s24  ;;  %s1515_s25 = int_to_ptr.vmem [resolvable:$true] %s1514_s25 }
 0x1e4   : > { %s1516_s6 = sshrl.u32 %s1273_s22, 4  ;;  %s1592_s16 = smov [#allocation3]  }
 0x1e5   : > { %s1521_s19 = scalar_lea.vmem %s1515_s25, %s1516_s6  ;;  %s1525_s30 = scalar_lea.vmem %s1592_s16, 4 }
 0x1e6   : > { %p1522_p13 = scmp.ne.s32.totalorder %s1515_s25, %s1521_s19  ;;  %p1527_p2 = scmp.lt.s32.totalorder %s1525_s30, %s1521_s19 }
 0x1e8   : > { %p1523_p0 = pnand %p1522_p13, %p1447_p12 }
 0x1ea   : > { %p1524_p1 = pneg %p1523_p0 }
 0x1ec   : > { %p1529_p3 = pnand %p1527_p2, %p1524_p1 }
 0x1ee   : > { %1532 = shalt.err (!%p1529_p3)
}
 0x1ef   : > { %s1533_s9 = sshra.s32 %s1277_s24, 4  ;;  %s1544_s20 = scalar_lea.hbm %s2311_s7, 3  ;;  %s1534_s9 = int_to_ptr.hbm [resolvable:$true] %s1533_s9 }
 0x1f0   : > { %s1540_s10 = scalar_lea.hbm %s1534_s9, %s1516_s6  ;;  %p1545_p8 = scmp.lt.s32.totalorder %s1534_s9, %s2311_s7 }
 0x1f1   : > { %p1541_p4 = scmp.ne.s32.totalorder %s1534_s9, %s1540_s10  ;;  %p1546_p9 = scmp.lt.s32.totalorder %s1544_s20, %s1540_s10 }
 0x1f3   : > { %p1542_p5 = pnand %p1541_p4, %p1447_p12  ;;  %p1547_p10 = por %p1546_p9, %p1545_p8 }
 0x1f5   : > { %p1543_p7 = pneg %p1542_p5 }
 0x1f7   : > { %p1548_p11 = pnand %p1547_p10, %p1543_p7 }
 0x1f9   : > { %1551 = shalt.err (!%p1548_p11)
}
 0x1fa   : > { %1279 = dma.vmem_to_hbm [thread:$0]  (%p1447_p12), %s1275_s23, %s1273_s22, %s1277_s24, %s2245_s14  }
 0x1fb PF: > { %p1467_p13 = scmp.ge.s32.totalorder %s1587_s29, 2  ;;  %s1288_s25 = sand.u32 1, %s1575_s26  }
 0x1fc   : > { %s1289_s6 = scalar_lea.sflag [#allocation4], %s1288_s25 }
 0x1fd   : > { %p1464_p0 = pnand %p1467_p13, %p1675_p6 }
 0x1ff   : > { %p1465_p1 = pneg %p1464_p0 }
 0x201   : > { %1570 = dma.done.wait (%p1465_p1), %s1289_s6, 32  }
 0x202   : > { %1572 = vsyncadd (%p1465_p1), %s1289_s6, 4294967264  ;;  %p18_p2 = scmp.ge.s32.totalorder %s1659_s8, 4   ;;  %s2316_s26 = smov %s1579_s27 }
 0x203   : > { %s2317_s27 = smov %s1583_s28  ;;  %s2318_s28 = smov %s1669_s11 }
 0x204   : > { %s2319_s29 = smov %s1659_s8  ;;  %20 = sbr.rel (!%p18_p2) target bundleno = 5 (0x5), region = 86 }
 0x209   :  { %1295 = vsyncpa [#allocation4], 1 }
 0x20a   :  { %1297 = vsyncpa [#allocation4 + $0x1], 1 }

</bundles_post_ra>
